<compile_context>
chip_gen: v7x
topology: tpu7x:2x2x1
jax: 0.10.0
libtpu: 0.0.40
codegen_flags: <defaults>
</compile_context>

<pallas_src>
import jax
import jax.numpy as jnp
from jax.experimental import pallas as pl
from jax.experimental.pallas import tpu as pltpu

NUM_LAYERS = 3


# ---------------- Fused kernel: 3-layer LSTM (batch row -1) + MLP head ------
def fused_lstm_mlp_kernel(x_ref,                               # (T, I) f32
                          wih0_ref, whh0_ref,                  # bf16 weights
                          wih1_ref, whh1_ref,
                          wih2_ref, whh2_ref,
                          w1_ref, b1_ref, w4_ref, b4_ref, w6_ref, b6_ref,
                          out_ref,                             # (T, out) f32
                          seq_ref):                            # VMEM (T, H) f32
    T = x_ref.shape[0]
    H = whh0_ref.shape[0]                                      # whh: (H, 4H)

    def run_layer(in_seq_f32, wih_ref, whh_ref):
        # Hoisted input projection: one batched matmul off the serial path.
        xproj = jnp.dot(in_seq_f32.astype(jnp.bfloat16), wih_ref[...],
                        preferred_element_type=jnp.float32)    # (T, 4H) f32
        whh = whh_ref[...]                                     # (H, 4H) bf16

        h = jnp.zeros((1, H), jnp.float32)
        c = jnp.zeros((1, H), jnp.float32)
        for t in range(T):                  # fully unrolled (T is static)
            gates = xproj[t:t + 1, :] + jnp.dot(
                h.astype(jnp.bfloat16), whh,
                preferred_element_type=jnp.float32)            # (1, 4H)
            # Activate the packed (1, 4H) vreg once per nonlinearity, then
            # slice gates (PyTorch order i, f, g, o).  Biases are zero-init'd.
            sig = jax.nn.sigmoid(gates)
            tng = jnp.tanh(gates)
            i_g = sig[:, 0 * H:1 * H]
            f_g = sig[:, 1 * H:2 * H]
            g_g = tng[:, 2 * H:3 * H]
            o_g = sig[:, 3 * H:4 * H]
            c = f_g * c + i_g * g_g
            h = o_g * jnp.tanh(c)
            seq_ref[pl.ds(t, 1), :] = h     # static-index store into scratch

    # Layer 0: x -> seq ; layers 1, 2 reuse seq in place (the hoisted xproj
    # reads the whole previous sequence before any overwrite).
    run_layer(x_ref[...], wih0_ref, whh0_ref)
    run_layer(seq_ref[...], wih1_ref, whh1_ref)
    run_layer(seq_ref[...], wih2_ref, whh2_ref)

    # -------- fused MLP head (torch: l1, l1, ReLU, l4, ReLU, l6, ReLU) ------
    h_seq = seq_ref[...]                                       # (T, H) f32
    w1 = w1_ref[...]
    b1 = b1_ref[...]
    y = jnp.dot(h_seq.astype(jnp.bfloat16), w1,
                preferred_element_type=jnp.float32) + b1                   # l1
    y = jnp.dot(y.astype(jnp.bfloat16), w1,
                preferred_element_type=jnp.float32) + b1                   # l1
    y = jnp.maximum(y, 0.0)                                                # l2
    y = jnp.dot(y.astype(jnp.bfloat16), w4_ref[...],
                preferred_element_type=jnp.float32) + b4_ref[...]          # l4
    y = jnp.maximum(y, 0.0)                                                # l5
    y = jnp.dot(y.astype(jnp.bfloat16), w6_ref[...],
                preferred_element_type=jnp.float32) + b6_ref[...]          # l6
    y = jnp.maximum(y, 0.0)                                                # l7
    out_ref[...] = y                                           # (T, out)


# ------------------------------- Wrapper ------------------------------------
def _vmem_spec():
    return pl.BlockSpec(memory_space=pltpu.MemorySpace.VMEM)


@jax.jit
def lstm_reg_forward(x, params):
    T, B, _ = x.shape
    H = params["whh"][0].shape[0]
    out_size = params["w6"].shape[1]

    # torch: x, _ = lstm(x); x = l1(x[:, -1, :]) ...
    # The LSTM recurrence never mixes batch rows, so only batch row B-1 of the
    # LSTM output is consumed -> run the recurrence for that single row only.
    x_last = x[:, -1, :]                                       # (T, I)

    args = [x_last,
            params["wih"][0], params["whh"][0],
            params["wih"][1], params["whh"][1],
            params["wih"][2], params["whh"][2],
            params["w1"], params["b1"],
            params["w4"], params["b4"],
            params["w6"], params["b6"]]

    return pl.pallas_call(
        fused_lstm_mlp_kernel,
        out_shape=jax.ShapeDtypeStruct((T, out_size), jnp.float32),
        in_specs=[_vmem_spec()] * len(args),
        out_specs=_vmem_spec(),
        scratch_shapes=[pltpu.VMEM((T, H), jnp.float32)],
    )(*args)


# ------------------------ Deterministic param init --------------------------
def init_params(key, input_size, hidden_size, output_size=1, num_layers=3):
    H = hidden_size
    keys = jax.random.split(key, 2 * num_layers + 3)

    def xavier_normal(k, out_dim, in_dim):
        std = (2.0 / (in_dim + out_dim)) ** 0.5
        return std * jax.random.normal(k, (out_dim, in_dim), jnp.float32)

    wih, whh = [], []
    for l in range(num_layers):
        in_dim = input_size if l == 0 else H
        # torch shapes: W_ih (4H, in_dim), W_hh (4H, H), xavier_normal_ init.
        # LSTM biases are explicitly zero-init'd in the module -> omitted.
        # Pass transposed (right-multiply) and pre-cast to bf16 for the MXU.
        wih.append(xavier_normal(keys[2 * l], 4 * H, in_dim).T
                   .astype(jnp.bfloat16))                      # (in, 4H)
        whh.append(xavier_normal(keys[2 * l + 1], 4 * H, H).T
                   .astype(jnp.bfloat16))                      # (H, 4H)

    def linear(k, out_dim, in_dim, xavier=False):
        kw, kb = jax.random.split(k)
        bound = 1.0 / (in_dim ** 0.5)
        if xavier:
            w = xavier_normal(kw, out_dim, in_dim)
        else:
            w = jax.random.uniform(kw, (out_dim, in_dim), jnp.float32,
                                   -bound, bound)
        b = jax.random.uniform(kb, (1, out_dim), jnp.float32, -bound, bound)
        return w.T.astype(jnp.bfloat16), b                     # (in, out), (1, out)

    w1, b1 = linear(keys[-3], H, H, xavier=True)               # l1 (xavier_normal_)
    w4, b4 = linear(keys[-2], H, H)                            # l4 (default init)
    w6, b6 = linear(keys[-1], output_size, H)                  # l6 (default init)
    return dict(wih=wih, whh=whh, w1=w1, b1=b1, w4=w4, b4=b4, w6=w6, b6=b6)


if __name__ == "__main__":
    key = jax.random.PRNGKey(0)
    kx, kp = jax.random.split(key)

    T, B, I, H = 8, 4, 8, 32          # seq_len, batch, input_size, hidden_size
    x = jax.random.normal(kx, (T, B, I), jnp.float32)
    params = init_params(kp, input_size=I, hidden_size=H,
                         output_size=1, num_layers=NUM_LAYERS)

    out = lstm_reg_forward(x, params)
    out = jax.block_until_ready(out)
    assert out.shape == (T, 1) and out.dtype == jnp.float32
    print("KERNEL_OK")
</pallas_src>

<mosaic_0001>
module attributes {stable_mosaic.version = 11 : i64} {
  func.func @fused_lstm_mlp_kernel(%arg0: memref<8x8xf32, #tpu.memory_space<vmem>>, %arg1: memref<8x128xbf16, #tpu.memory_space<vmem>>, %arg2: memref<32x128xbf16, #tpu.memory_space<vmem>>, %arg3: memref<32x128xbf16, #tpu.memory_space<vmem>>, %arg4: memref<32x128xbf16, #tpu.memory_space<vmem>>, %arg5: memref<32x128xbf16, #tpu.memory_space<vmem>>, %arg6: memref<32x128xbf16, #tpu.memory_space<vmem>>, %arg7: memref<32x32xbf16, #tpu.memory_space<vmem>>, %arg8: memref<1x32xf32, #tpu.memory_space<vmem>>, %arg9: memref<32x32xbf16, #tpu.memory_space<vmem>>, %arg10: memref<1x32xf32, #tpu.memory_space<vmem>>, %arg11: memref<32x1xbf16, #tpu.memory_space<vmem>>, %arg12: memref<1x1xf32, #tpu.memory_space<vmem>>, %arg13: memref<8x1xf32, #tpu.memory_space<vmem>>, %arg14: memref<8x32xf32, #tpu.memory_space<vmem>>) attributes {dimension_semantics = [], scalar_prefetch = 0 : i64, scratch_operands = 1 : i64, tpu.core_type = #tpu.core_type<tc>} {
    %c0 = arith.constant 0 : index
    %c0_0 = arith.constant 0 : index
    %0 = vector.load %arg0[%c0, %c0_0] : memref<8x8xf32, #tpu.memory_space<vmem>>, vector<8x8xf32>
    %1 = arith.truncf %0 : vector<8x8xf32> to vector<8x8xbf16>
    %c0_1 = arith.constant 0 : index
    %c0_2 = arith.constant 0 : index
    %2 = vector.load %arg1[%c0_1, %c0_2] : memref<8x128xbf16, #tpu.memory_space<vmem>>, vector<8x128xbf16>
    %cst = arith.constant dense<0.000000e+00> : vector<8x128xf32>
    %3 = tpu.matmul %1, %2, %cst {dimension_numbers = #tpu.dot_dimension_numbers<[1], [0], [0], [1], [0, 0, 1, 1], [], []>} : vector<8x8xbf16>, vector<8x128xbf16>, vector<8x128xf32> -> vector<8x128xf32>
    %c0_3 = arith.constant 0 : index
    %c0_4 = arith.constant 0 : index
    %4 = vector.load %arg2[%c0_3, %c0_4] : memref<32x128xbf16, #tpu.memory_space<vmem>>, vector<32x128xbf16>
    %cst_5 = arith.constant 0.000000e+00 : f32
    %5 = vector.broadcast %cst_5 : f32 to vector<1x32xf32>
    %cst_6 = arith.constant 0.000000e+00 : f32
    %6 = vector.broadcast %cst_6 : f32 to vector<1x32xf32>
    %7 = vector.extract_strided_slice %3 {offsets = [0, 0], sizes = [1, 128], strides = [1, 1]} : vector<8x128xf32> to vector<1x128xf32>
    %8 = arith.truncf %5 : vector<1x32xf32> to vector<1x32xbf16>
    %cst_7 = arith.constant dense<0.000000e+00> : vector<1x128xf32>
    %9 = tpu.matmul %8, %4, %cst_7 {dimension_numbers = #tpu.dot_dimension_numbers<[1], [0], [0], [1], [0, 0, 1, 1], [], []>} : vector<1x32xbf16>, vector<32x128xbf16>, vector<1x128xf32> -> vector<1x128xf32>
    %10 = arith.addf %7, %9 : vector<1x128xf32>
    %11 = arith.negf %10 : vector<1x128xf32>
    %12 = math.exp %11 : vector<1x128xf32>
    %cst_8 = arith.constant 1.000000e+00 : f32
    %13 = vector.broadcast %cst_8 : f32 to vector<1x128xf32>
    %14 = arith.addf %13, %12 : vector<1x128xf32>
    %15 = arith.divf %13, %14 : vector<1x128xf32>
    %16 = math.tanh %10 : vector<1x128xf32>
    %17 = vector.extract_strided_slice %15 {offsets = [0, 0], sizes = [1, 32], strides = [1, 1]} : vector<1x128xf32> to vector<1x32xf32>
    %18 = vector.extract_strided_slice %15 {offsets = [0, 32], sizes = [1, 32], strides = [1, 1]} : vector<1x128xf32> to vector<1x32xf32>
    %19 = vector.extract_strided_slice %16 {offsets = [0, 64], sizes = [1, 32], strides = [1, 1]} : vector<1x128xf32> to vector<1x32xf32>
    %20 = vector.extract_strided_slice %15 {offsets = [0, 96], sizes = [1, 32], strides = [1, 1]} : vector<1x128xf32> to vector<1x32xf32>
    %21 = arith.mulf %18, %6 : vector<1x32xf32>
    %22 = arith.mulf %17, %19 : vector<1x32xf32>
    %23 = arith.addf %21, %22 : vector<1x32xf32>
    %24 = math.tanh %23 : vector<1x32xf32>
    %25 = arith.mulf %20, %24 : vector<1x32xf32>
    %c0_9 = arith.constant 0 : index
    %c0_10 = arith.constant 0 : index
    %26 = vector.load %arg14[%c0_9, %c0_10] : memref<8x32xf32, #tpu.memory_space<vmem>>, vector<1x32xf32>
    tpu.vector_store %arg14[%c0_9, %c0_10], %25 {strides = array<i32>} : memref<8x32xf32, #tpu.memory_space<vmem>>, vector<1x32xf32>,
    %27 = vector.extract_strided_slice %3 {offsets = [1, 0], sizes = [1, 128], strides = [1, 1]} : vector<8x128xf32> to vector<1x128xf32>
    %28 = arith.truncf %25 : vector<1x32xf32> to vector<1x32xbf16>
    %cst_11 = arith.constant dense<0.000000e+00> : vector<1x128xf32>
    %29 = tpu.matmul %28, %4, %cst_11 {dimension_numbers = #tpu.dot_dimension_numbers<[1], [0], [0], [1], [0, 0, 1, 1], [], []>} : vector<1x32xbf16>, vector<32x128xbf16>, vector<1x128xf32> -> vector<1x128xf32>
    %30 = arith.addf %27, %29 : vector<1x128xf32>
    %31 = arith.negf %30 : vector<1x128xf32>
    %32 = math.exp %31 : vector<1x128xf32>
    %cst_12 = arith.constant 1.000000e+00 : f32
    %33 = vector.broadcast %cst_12 : f32 to vector<1x128xf32>
    %34 = arith.addf %33, %32 : vector<1x128xf32>
    %35 = arith.divf %33, %34 : vector<1x128xf32>
    %36 = math.tanh %30 : vector<1x128xf32>
    %37 = vector.extract_strided_slice %35 {offsets = [0, 0], sizes = [1, 32], strides = [1, 1]} : vector<1x128xf32> to vector<1x32xf32>
    %38 = vector.extract_strided_slice %35 {offsets = [0, 32], sizes = [1, 32], strides = [1, 1]} : vector<1x128xf32> to vector<1x32xf32>
    %39 = vector.extract_strided_slice %36 {offsets = [0, 64], sizes = [1, 32], strides = [1, 1]} : vector<1x128xf32> to vector<1x32xf32>
    %40 = vector.extract_strided_slice %35 {offsets = [0, 96], sizes = [1, 32], strides = [1, 1]} : vector<1x128xf32> to vector<1x32xf32>
    %41 = arith.mulf %38, %23 : vector<1x32xf32>
    %42 = arith.mulf %37, %39 : vector<1x32xf32>
    %43 = arith.addf %41, %42 : vector<1x32xf32>
    %44 = math.tanh %43 : vector<1x32xf32>
    %45 = arith.mulf %40, %44 : vector<1x32xf32>
    %c1 = arith.constant 1 : index
    %c0_13 = arith.constant 0 : index
    %46 = vector.load %arg14[%c1, %c0_13] : memref<8x32xf32, #tpu.memory_space<vmem>>, vector<1x32xf32>
    tpu.vector_store %arg14[%c1, %c0_13], %45 {strides = array<i32>} : memref<8x32xf32, #tpu.memory_space<vmem>>, vector<1x32xf32>,
    %47 = vector.extract_strided_slice %3 {offsets = [2, 0], sizes = [1, 128], strides = [1, 1]} : vector<8x128xf32> to vector<1x128xf32>
    %48 = arith.truncf %45 : vector<1x32xf32> to vector<1x32xbf16>
    %cst_14 = arith.constant dense<0.000000e+00> : vector<1x128xf32>
    %49 = tpu.matmul %48, %4, %cst_14 {dimension_numbers = #tpu.dot_dimension_numbers<[1], [0], [0], [1], [0, 0, 1, 1], [], []>} : vector<1x32xbf16>, vector<32x128xbf16>, vector<1x128xf32> -> vector<1x128xf32>
    %50 = arith.addf %47, %49 : vector<1x128xf32>
    %51 = arith.negf %50 : vector<1x128xf32>
    %52 = math.exp %51 : vector<1x128xf32>
    %cst_15 = arith.constant 1.000000e+00 : f32
    %53 = vector.broadcast %cst_15 : f32 to vector<1x128xf32>
    %54 = arith.addf %53, %52 : vector<1x128xf32>
    %55 = arith.divf %53, %54 : vector<1x128xf32>
    %56 = math.tanh %50 : vector<1x128xf32>
    %57 = vector.extract_strided_slice %55 {offsets = [0, 0], sizes = [1, 32], strides = [1, 1]} : vector<1x128xf32> to vector<1x32xf32>
    %58 = vector.extract_strided_slice %55 {offsets = [0, 32], sizes = [1, 32], strides = [1, 1]} : vector<1x128xf32> to vector<1x32xf32>
    %59 = vector.extract_strided_slice %56 {offsets = [0, 64], sizes = [1, 32], strides = [1, 1]} : vector<1x128xf32> to vector<1x32xf32>
    %60 = vector.extract_strided_slice %55 {offsets = [0, 96], sizes = [1, 32], strides = [1, 1]} : vector<1x128xf32> to vector<1x32xf32>
    %61 = arith.mulf %58, %43 : vector<1x32xf32>
    %62 = arith.mulf %57, %59 : vector<1x32xf32>
    %63 = arith.addf %61, %62 : vector<1x32xf32>
    %64 = math.tanh %63 : vector<1x32xf32>
    %65 = arith.mulf %60, %64 : vector<1x32xf32>
    %c2 = arith.constant 2 : index
    %c0_16 = arith.constant 0 : index
    %66 = vector.load %arg14[%c2, %c0_16] : memref<8x32xf32, #tpu.memory_space<vmem>>, vector<1x32xf32>
    tpu.vector_store %arg14[%c2, %c0_16], %65 {strides = array<i32>} : memref<8x32xf32, #tpu.memory_space<vmem>>, vector<1x32xf32>,
    %67 = vector.extract_strided_slice %3 {offsets = [3, 0], sizes = [1, 128], strides = [1, 1]} : vector<8x128xf32> to vector<1x128xf32>
    %68 = arith.truncf %65 : vector<1x32xf32> to vector<1x32xbf16>
    %cst_17 = arith.constant dense<0.000000e+00> : vector<1x128xf32>
    %69 = tpu.matmul %68, %4, %cst_17 {dimension_numbers = #tpu.dot_dimension_numbers<[1], [0], [0], [1], [0, 0, 1, 1], [], []>} : vector<1x32xbf16>, vector<32x128xbf16>, vector<1x128xf32> -> vector<1x128xf32>
    %70 = arith.addf %67, %69 : vector<1x128xf32>
    %71 = arith.negf %70 : vector<1x128xf32>
    %72 = math.exp %71 : vector<1x128xf32>
    %cst_18 = arith.constant 1.000000e+00 : f32
    %73 = vector.broadcast %cst_18 : f32 to vector<1x128xf32>
    %74 = arith.addf %73, %72 : vector<1x128xf32>
    %75 = arith.divf %73, %74 : vector<1x128xf32>
    %76 = math.tanh %70 : vector<1x128xf32>
    %77 = vector.extract_strided_slice %75 {offsets = [0, 0], sizes = [1, 32], strides = [1, 1]} : vector<1x128xf32> to vector<1x32xf32>
    %78 = vector.extract_strided_slice %75 {offsets = [0, 32], sizes = [1, 32], strides = [1, 1]} : vector<1x128xf32> to vector<1x32xf32>
    %79 = vector.extract_strided_slice %76 {offsets = [0, 64], sizes = [1, 32], strides = [1, 1]} : vector<1x128xf32> to vector<1x32xf32>
    %80 = vector.extract_strided_slice %75 {offsets = [0, 96], sizes = [1, 32], strides = [1, 1]} : vector<1x128xf32> to vector<1x32xf32>
    %81 = arith.mulf %78, %63 : vector<1x32xf32>
    %82 = arith.mulf %77, %79 : vector<1x32xf32>
    %83 = arith.addf %81, %82 : vector<1x32xf32>
    %84 = math.tanh %83 : vector<1x32xf32>
    %85 = arith.mulf %80, %84 : vector<1x32xf32>
    %c3 = arith.constant 3 : index
    %c0_19 = arith.constant 0 : index
    %86 = vector.load %arg14[%c3, %c0_19] : memref<8x32xf32, #tpu.memory_space<vmem>>, vector<1x32xf32>
    tpu.vector_store %arg14[%c3, %c0_19], %85 {strides = array<i32>} : memref<8x32xf32, #tpu.memory_space<vmem>>, vector<1x32xf32>,
    %87 = vector.extract_strided_slice %3 {offsets = [4, 0], sizes = [1, 128], strides = [1, 1]} : vector<8x128xf32> to vector<1x128xf32>
    %88 = arith.truncf %85 : vector<1x32xf32> to vector<1x32xbf16>
    %cst_20 = arith.constant dense<0.000000e+00> : vector<1x128xf32>
    %89 = tpu.matmul %88, %4, %cst_20 {dimension_numbers = #tpu.dot_dimension_numbers<[1], [0], [0], [1], [0, 0, 1, 1], [], []>} : vector<1x32xbf16>, vector<32x128xbf16>, vector<1x128xf32> -> vector<1x128xf32>
    %90 = arith.addf %87, %89 : vector<1x128xf32>
    %91 = arith.negf %90 : vector<1x128xf32>
    %92 = math.exp %91 : vector<1x128xf32>
    %cst_21 = arith.constant 1.000000e+00 : f32
    %93 = vector.broadcast %cst_21 : f32 to vector<1x128xf32>
    %94 = arith.addf %93, %92 : vector<1x128xf32>
    %95 = arith.divf %93, %94 : vector<1x128xf32>
    %96 = math.tanh %90 : vector<1x128xf32>
    %97 = vector.extract_strided_slice %95 {offsets = [0, 0], sizes = [1, 32], strides = [1, 1]} : vector<1x128xf32> to vector<1x32xf32>
    %98 = vector.extract_strided_slice %95 {offsets = [0, 32], sizes = [1, 32], strides = [1, 1]} : vector<1x128xf32> to vector<1x32xf32>
    %99 = vector.extract_strided_slice %96 {offsets = [0, 64], sizes = [1, 32], strides = [1, 1]} : vector<1x128xf32> to vector<1x32xf32>
    %100 = vector.extract_strided_slice %95 {offsets = [0, 96], sizes = [1, 32], strides = [1, 1]} : vector<1x128xf32> to vector<1x32xf32>
    %101 = arith.mulf %98, %83 : vector<1x32xf32>
    %102 = arith.mulf %97, %99 : vector<1x32xf32>
    %103 = arith.addf %101, %102 : vector<1x32xf32>
    %104 = math.tanh %103 : vector<1x32xf32>
    %105 = arith.mulf %100, %104 : vector<1x32xf32>
    %c4 = arith.constant 4 : index
    %c0_22 = arith.constant 0 : index
    %106 = vector.load %arg14[%c4, %c0_22] : memref<8x32xf32, #tpu.memory_space<vmem>>, vector<1x32xf32>
    tpu.vector_store %arg14[%c4, %c0_22], %105 {strides = array<i32>} : memref<8x32xf32, #tpu.memory_space<vmem>>, vector<1x32xf32>,
    %107 = vector.extract_strided_slice %3 {offsets = [5, 0], sizes = [1, 128], strides = [1, 1]} : vector<8x128xf32> to vector<1x128xf32>
    %108 = arith.truncf %105 : vector<1x32xf32> to vector<1x32xbf16>
    %cst_23 = arith.constant dense<0.000000e+00> : vector<1x128xf32>
    %109 = tpu.matmul %108, %4, %cst_23 {dimension_numbers = #tpu.dot_dimension_numbers<[1], [0], [0], [1], [0, 0, 1, 1], [], []>} : vector<1x32xbf16>, vector<32x128xbf16>, vector<1x128xf32> -> vector<1x128xf32>
    %110 = arith.addf %107, %109 : vector<1x128xf32>
    %111 = arith.negf %110 : vector<1x128xf32>
    %112 = math.exp %111 : vector<1x128xf32>
    %cst_24 = arith.constant 1.000000e+00 : f32
    %113 = vector.broadcast %cst_24 : f32 to vector<1x128xf32>
    %114 = arith.addf %113, %112 : vector<1x128xf32>
    %115 = arith.divf %113, %114 : vector<1x128xf32>
    %116 = math.tanh %110 : vector<1x128xf32>
    %117 = vector.extract_strided_slice %115 {offsets = [0, 0], sizes = [1, 32], strides = [1, 1]} : vector<1x128xf32> to vector<1x32xf32>
    %118 = vector.extract_strided_slice %115 {offsets = [0, 32], sizes = [1, 32], strides = [1, 1]} : vector<1x128xf32> to vector<1x32xf32>
    %119 = vector.extract_strided_slice %116 {offsets = [0, 64], sizes = [1, 32], strides = [1, 1]} : vector<1x128xf32> to vector<1x32xf32>
    %120 = vector.extract_strided_slice %115 {offsets = [0, 96], sizes = [1, 32], strides = [1, 1]} : vector<1x128xf32> to vector<1x32xf32>
    %121 = arith.mulf %118, %103 : vector<1x32xf32>
    %122 = arith.mulf %117, %119 : vector<1x32xf32>
    %123 = arith.addf %121, %122 : vector<1x32xf32>
    %124 = math.tanh %123 : vector<1x32xf32>
    %125 = arith.mulf %120, %124 : vector<1x32xf32>
    %c5 = arith.constant 5 : index
    %c0_25 = arith.constant 0 : index
    %126 = vector.load %arg14[%c5, %c0_25] : memref<8x32xf32, #tpu.memory_space<vmem>>, vector<1x32xf32>
    tpu.vector_store %arg14[%c5, %c0_25], %125 {strides = array<i32>} : memref<8x32xf32, #tpu.memory_space<vmem>>, vector<1x32xf32>,
    %127 = vector.extract_strided_slice %3 {offsets = [6, 0], sizes = [1, 128], strides = [1, 1]} : vector<8x128xf32> to vector<1x128xf32>
    %128 = arith.truncf %125 : vector<1x32xf32> to vector<1x32xbf16>
    %cst_26 = arith.constant dense<0.000000e+00> : vector<1x128xf32>
    %129 = tpu.matmul %128, %4, %cst_26 {dimension_numbers = #tpu.dot_dimension_numbers<[1], [0], [0], [1], [0, 0, 1, 1], [], []>} : vector<1x32xbf16>, vector<32x128xbf16>, vector<1x128xf32> -> vector<1x128xf32>
    %130 = arith.addf %127, %129 : vector<1x128xf32>
    %131 = arith.negf %130 : vector<1x128xf32>
    %132 = math.exp %131 : vector<1x128xf32>
    %cst_27 = arith.constant 1.000000e+00 : f32
    %133 = vector.broadcast %cst_27 : f32 to vector<1x128xf32>
    %134 = arith.addf %133, %132 : vector<1x128xf32>
    %135 = arith.divf %133, %134 : vector<1x128xf32>
    %136 = math.tanh %130 : vector<1x128xf32>
    %137 = vector.extract_strided_slice %135 {offsets = [0, 0], sizes = [1, 32], strides = [1, 1]} : vector<1x128xf32> to vector<1x32xf32>
    %138 = vector.extract_strided_slice %135 {offsets = [0, 32], sizes = [1, 32], strides = [1, 1]} : vector<1x128xf32> to vector<1x32xf32>
    %139 = vector.extract_strided_slice %136 {offsets = [0, 64], sizes = [1, 32], strides = [1, 1]} : vector<1x128xf32> to vector<1x32xf32>
    %140 = vector.extract_strided_slice %135 {offsets = [0, 96], sizes = [1, 32], strides = [1, 1]} : vector<1x128xf32> to vector<1x32xf32>
    %141 = arith.mulf %138, %123 : vector<1x32xf32>
    %142 = arith.mulf %137, %139 : vector<1x32xf32>
    %143 = arith.addf %141, %142 : vector<1x32xf32>
    %144 = math.tanh %143 : vector<1x32xf32>
    %145 = arith.mulf %140, %144 : vector<1x32xf32>
    %c6 = arith.constant 6 : index
    %c0_28 = arith.constant 0 : index
    %146 = vector.load %arg14[%c6, %c0_28] : memref<8x32xf32, #tpu.memory_space<vmem>>, vector<1x32xf32>
    tpu.vector_store %arg14[%c6, %c0_28], %145 {strides = array<i32>} : memref<8x32xf32, #tpu.memory_space<vmem>>, vector<1x32xf32>,
    %147 = vector.extract_strided_slice %3 {offsets = [7, 0], sizes = [1, 128], strides = [1, 1]} : vector<8x128xf32> to vector<1x128xf32>
    %148 = arith.truncf %145 : vector<1x32xf32> to vector<1x32xbf16>
    %cst_29 = arith.constant dense<0.000000e+00> : vector<1x128xf32>
    %149 = tpu.matmul %148, %4, %cst_29 {dimension_numbers = #tpu.dot_dimension_numbers<[1], [0], [0], [1], [0, 0, 1, 1], [], []>} : vector<1x32xbf16>, vector<32x128xbf16>, vector<1x128xf32> -> vector<1x128xf32>
    %150 = arith.addf %147, %149 : vector<1x128xf32>
    %151 = arith.negf %150 : vector<1x128xf32>
    %152 = math.exp %151 : vector<1x128xf32>
    %cst_30 = arith.constant 1.000000e+00 : f32
    %153 = vector.broadcast %cst_30 : f32 to vector<1x128xf32>
    %154 = arith.addf %153, %152 : vector<1x128xf32>
    %155 = arith.divf %153, %154 : vector<1x128xf32>
    %156 = math.tanh %150 : vector<1x128xf32>
    %157 = vector.extract_strided_slice %155 {offsets = [0, 0], sizes = [1, 32], strides = [1, 1]} : vector<1x128xf32> to vector<1x32xf32>
    %158 = vector.extract_strided_slice %155 {offsets = [0, 32], sizes = [1, 32], strides = [1, 1]} : vector<1x128xf32> to vector<1x32xf32>
    %159 = vector.extract_strided_slice %156 {offsets = [0, 64], sizes = [1, 32], strides = [1, 1]} : vector<1x128xf32> to vector<1x32xf32>
    %160 = vector.extract_strided_slice %155 {offsets = [0, 96], sizes = [1, 32], strides = [1, 1]} : vector<1x128xf32> to vector<1x32xf32>
    %161 = arith.mulf %158, %143 : vector<1x32xf32>
    %162 = arith.mulf %157, %159 : vector<1x32xf32>
    %163 = arith.addf %161, %162 : vector<1x32xf32>
    %164 = math.tanh %163 : vector<1x32xf32>
    %165 = arith.mulf %160, %164 : vector<1x32xf32>
    %c7 = arith.constant 7 : index
    %c0_31 = arith.constant 0 : index
    %166 = vector.load %arg14[%c7, %c0_31] : memref<8x32xf32, #tpu.memory_space<vmem>>, vector<1x32xf32>
    tpu.vector_store %arg14[%c7, %c0_31], %165 {strides = array<i32>} : memref<8x32xf32, #tpu.memory_space<vmem>>, vector<1x32xf32>,
    %c0_32 = arith.constant 0 : index
    %c0_33 = arith.constant 0 : index
    %167 = vector.load %arg14[%c0_32, %c0_33] : memref<8x32xf32, #tpu.memory_space<vmem>>, vector<8x32xf32>
    %168 = arith.truncf %167 : vector<8x32xf32> to vector<8x32xbf16>
    %c0_34 = arith.constant 0 : index
    %c0_35 = arith.constant 0 : index
    %169 = vector.load %arg3[%c0_34, %c0_35] : memref<32x128xbf16, #tpu.memory_space<vmem>>, vector<32x128xbf16>
    %cst_36 = arith.constant dense<0.000000e+00> : vector<8x128xf32>
    %170 = tpu.matmul %168, %169, %cst_36 {dimension_numbers = #tpu.dot_dimension_numbers<[1], [0], [0], [1], [0, 0, 1, 1], [], []>} : vector<8x32xbf16>, vector<32x128xbf16>, vector<8x128xf32> -> vector<8x128xf32>
    %c0_37 = arith.constant 0 : index
    %c0_38 = arith.constant 0 : index
    %171 = vector.load %arg4[%c0_37, %c0_38] : memref<32x128xbf16, #tpu.memory_space<vmem>>, vector<32x128xbf16>
    %cst_39 = arith.constant 0.000000e+00 : f32
    %172 = vector.broadcast %cst_39 : f32 to vector<1x32xf32>
    %cst_40 = arith.constant 0.000000e+00 : f32
    %173 = vector.broadcast %cst_40 : f32 to vector<1x32xf32>
    %174 = vector.extract_strided_slice %170 {offsets = [0, 0], sizes = [1, 128], strides = [1, 1]} : vector<8x128xf32> to vector<1x128xf32>
    %175 = arith.truncf %172 : vector<1x32xf32> to vector<1x32xbf16>
    %cst_41 = arith.constant dense<0.000000e+00> : vector<1x128xf32>
    %176 = tpu.matmul %175, %171, %cst_41 {dimension_numbers = #tpu.dot_dimension_numbers<[1], [0], [0], [1], [0, 0, 1, 1], [], []>} : vector<1x32xbf16>, vector<32x128xbf16>, vector<1x128xf32> -> vector<1x128xf32>
    %177 = arith.addf %174, %176 : vector<1x128xf32>
    %178 = arith.negf %177 : vector<1x128xf32>
    %179 = math.exp %178 : vector<1x128xf32>
    %cst_42 = arith.constant 1.000000e+00 : f32
    %180 = vector.broadcast %cst_42 : f32 to vector<1x128xf32>
    %181 = arith.addf %180, %179 : vector<1x128xf32>
    %182 = arith.divf %180, %181 : vector<1x128xf32>
    %183 = math.tanh %177 : vector<1x128xf32>
    %184 = vector.extract_strided_slice %182 {offsets = [0, 0], sizes = [1, 32], strides = [1, 1]} : vector<1x128xf32> to vector<1x32xf32>
    %185 = vector.extract_strided_slice %182 {offsets = [0, 32], sizes = [1, 32], strides = [1, 1]} : vector<1x128xf32> to vector<1x32xf32>
    %186 = vector.extract_strided_slice %183 {offsets = [0, 64], sizes = [1, 32], strides = [1, 1]} : vector<1x128xf32> to vector<1x32xf32>
    %187 = vector.extract_strided_slice %182 {offsets = [0, 96], sizes = [1, 32], strides = [1, 1]} : vector<1x128xf32> to vector<1x32xf32>
    %188 = arith.mulf %185, %173 : vector<1x32xf32>
    %189 = arith.mulf %184, %186 : vector<1x32xf32>
    %190 = arith.addf %188, %189 : vector<1x32xf32>
    %191 = math.tanh %190 : vector<1x32xf32>
    %192 = arith.mulf %187, %191 : vector<1x32xf32>
    %c0_43 = arith.constant 0 : index
    %c0_44 = arith.constant 0 : index
    %193 = vector.load %arg14[%c0_43, %c0_44] : memref<8x32xf32, #tpu.memory_space<vmem>>, vector<1x32xf32>
    tpu.vector_store %arg14[%c0_43, %c0_44], %192 {strides = array<i32>} : memref<8x32xf32, #tpu.memory_space<vmem>>, vector<1x32xf32>,
    %194 = vector.extract_strided_slice %170 {offsets = [1, 0], sizes = [1, 128], strides = [1, 1]} : vector<8x128xf32> to vector<1x128xf32>
    %195 = arith.truncf %192 : vector<1x32xf32> to vector<1x32xbf16>
    %cst_45 = arith.constant dense<0.000000e+00> : vector<1x128xf32>
    %196 = tpu.matmul %195, %171, %cst_45 {dimension_numbers = #tpu.dot_dimension_numbers<[1], [0], [0], [1], [0, 0, 1, 1], [], []>} : vector<1x32xbf16>, vector<32x128xbf16>, vector<1x128xf32> -> vector<1x128xf32>
    %197 = arith.addf %194, %196 : vector<1x128xf32>
    %198 = arith.negf %197 : vector<1x128xf32>
    %199 = math.exp %198 : vector<1x128xf32>
    %cst_46 = arith.constant 1.000000e+00 : f32
    %200 = vector.broadcast %cst_46 : f32 to vector<1x128xf32>
    %201 = arith.addf %200, %199 : vector<1x128xf32>
    %202 = arith.divf %200, %201 : vector<1x128xf32>
    %203 = math.tanh %197 : vector<1x128xf32>
    %204 = vector.extract_strided_slice %202 {offsets = [0, 0], sizes = [1, 32], strides = [1, 1]} : vector<1x128xf32> to vector<1x32xf32>
    %205 = vector.extract_strided_slice %202 {offsets = [0, 32], sizes = [1, 32], strides = [1, 1]} : vector<1x128xf32> to vector<1x32xf32>
    %206 = vector.extract_strided_slice %203 {offsets = [0, 64], sizes = [1, 32], strides = [1, 1]} : vector<1x128xf32> to vector<1x32xf32>
    %207 = vector.extract_strided_slice %202 {offsets = [0, 96], sizes = [1, 32], strides = [1, 1]} : vector<1x128xf32> to vector<1x32xf32>
    %208 = arith.mulf %205, %190 : vector<1x32xf32>
    %209 = arith.mulf %204, %206 : vector<1x32xf32>
    %210 = arith.addf %208, %209 : vector<1x32xf32>
    %211 = math.tanh %210 : vector<1x32xf32>
    %212 = arith.mulf %207, %211 : vector<1x32xf32>
    %c1_47 = arith.constant 1 : index
    %c0_48 = arith.constant 0 : index
    %213 = vector.load %arg14[%c1_47, %c0_48] : memref<8x32xf32, #tpu.memory_space<vmem>>, vector<1x32xf32>
    tpu.vector_store %arg14[%c1_47, %c0_48], %212 {strides = array<i32>} : memref<8x32xf32, #tpu.memory_space<vmem>>, vector<1x32xf32>,
    %214 = vector.extract_strided_slice %170 {offsets = [2, 0], sizes = [1, 128], strides = [1, 1]} : vector<8x128xf32> to vector<1x128xf32>
    %215 = arith.truncf %212 : vector<1x32xf32> to vector<1x32xbf16>
    %cst_49 = arith.constant dense<0.000000e+00> : vector<1x128xf32>
    %216 = tpu.matmul %215, %171, %cst_49 {dimension_numbers = #tpu.dot_dimension_numbers<[1], [0], [0], [1], [0, 0, 1, 1], [], []>} : vector<1x32xbf16>, vector<32x128xbf16>, vector<1x128xf32> -> vector<1x128xf32>
    %217 = arith.addf %214, %216 : vector<1x128xf32>
    %218 = arith.negf %217 : vector<1x128xf32>
    %219 = math.exp %218 : vector<1x128xf32>
    %cst_50 = arith.constant 1.000000e+00 : f32
    %220 = vector.broadcast %cst_50 : f32 to vector<1x128xf32>
    %221 = arith.addf %220, %219 : vector<1x128xf32>
    %222 = arith.divf %220, %221 : vector<1x128xf32>
    %223 = math.tanh %217 : vector<1x128xf32>
    %224 = vector.extract_strided_slice %222 {offsets = [0, 0], sizes = [1, 32], strides = [1, 1]} : vector<1x128xf32> to vector<1x32xf32>
    %225 = vector.extract_strided_slice %222 {offsets = [0, 32], sizes = [1, 32], strides = [1, 1]} : vector<1x128xf32> to vector<1x32xf32>
    %226 = vector.extract_strided_slice %223 {offsets = [0, 64], sizes = [1, 32], strides = [1, 1]} : vector<1x128xf32> to vector<1x32xf32>
    %227 = vector.extract_strided_slice %222 {offsets = [0, 96], sizes = [1, 32], strides = [1, 1]} : vector<1x128xf32> to vector<1x32xf32>
    %228 = arith.mulf %225, %210 : vector<1x32xf32>
    %229 = arith.mulf %224, %226 : vector<1x32xf32>
    %230 = arith.addf %228, %229 : vector<1x32xf32>
    %231 = math.tanh %230 : vector<1x32xf32>
    %232 = arith.mulf %227, %231 : vector<1x32xf32>
    %c2_51 = arith.constant 2 : index
    %c0_52 = arith.constant 0 : index
    %233 = vector.load %arg14[%c2_51, %c0_52] : memref<8x32xf32, #tpu.memory_space<vmem>>, vector<1x32xf32>
    tpu.vector_store %arg14[%c2_51, %c0_52], %232 {strides = array<i32>} : memref<8x32xf32, #tpu.memory_space<vmem>>, vector<1x32xf32>,
    %234 = vector.extract_strided_slice %170 {offsets = [3, 0], sizes = [1, 128], strides = [1, 1]} : vector<8x128xf32> to vector<1x128xf32>
    %235 = arith.truncf %232 : vector<1x32xf32> to vector<1x32xbf16>
    %cst_53 = arith.constant dense<0.000000e+00> : vector<1x128xf32>
    %236 = tpu.matmul %235, %171, %cst_53 {dimension_numbers = #tpu.dot_dimension_numbers<[1], [0], [0], [1], [0, 0, 1, 1], [], []>} : vector<1x32xbf16>, vector<32x128xbf16>, vector<1x128xf32> -> vector<1x128xf32>
    %237 = arith.addf %234, %236 : vector<1x128xf32>
    %238 = arith.negf %237 : vector<1x128xf32>
    %239 = math.exp %238 : vector<1x128xf32>
    %cst_54 = arith.constant 1.000000e+00 : f32
    %240 = vector.broadcast %cst_54 : f32 to vector<1x128xf32>
    %241 = arith.addf %240, %239 : vector<1x128xf32>
    %242 = arith.divf %240, %241 : vector<1x128xf32>
    %243 = math.tanh %237 : vector<1x128xf32>
    %244 = vector.extract_strided_slice %242 {offsets = [0, 0], sizes = [1, 32], strides = [1, 1]} : vector<1x128xf32> to vector<1x32xf32>
    %245 = vector.extract_strided_slice %242 {offsets = [0, 32], sizes = [1, 32], strides = [1, 1]} : vector<1x128xf32> to vector<1x32xf32>
    %246 = vector.extract_strided_slice %243 {offsets = [0, 64], sizes = [1, 32], strides = [1, 1]} : vector<1x128xf32> to vector<1x32xf32>
    %247 = vector.extract_strided_slice %242 {offsets = [0, 96], sizes = [1, 32], strides = [1, 1]} : vector<1x128xf32> to vector<1x32xf32>
    %248 = arith.mulf %245, %230 : vector<1x32xf32>
    %249 = arith.mulf %244, %246 : vector<1x32xf32>
    %250 = arith.addf %248, %249 : vector<1x32xf32>
    %251 = math.tanh %250 : vector<1x32xf32>
    %252 = arith.mulf %247, %251 : vector<1x32xf32>
    %c3_55 = arith.constant 3 : index
    %c0_56 = arith.constant 0 : index
    %253 = vector.load %arg14[%c3_55, %c0_56] : memref<8x32xf32, #tpu.memory_space<vmem>>, vector<1x32xf32>
    tpu.vector_store %arg14[%c3_55, %c0_56], %252 {strides = array<i32>} : memref<8x32xf32, #tpu.memory_space<vmem>>, vector<1x32xf32>,
    %254 = vector.extract_strided_slice %170 {offsets = [4, 0], sizes = [1, 128], strides = [1, 1]} : vector<8x128xf32> to vector<1x128xf32>
    %255 = arith.truncf %252 : vector<1x32xf32> to vector<1x32xbf16>
    %cst_57 = arith.constant dense<0.000000e+00> : vector<1x128xf32>
    %256 = tpu.matmul %255, %171, %cst_57 {dimension_numbers = #tpu.dot_dimension_numbers<[1], [0], [0], [1], [0, 0, 1, 1], [], []>} : vector<1x32xbf16>, vector<32x128xbf16>, vector<1x128xf32> -> vector<1x128xf32>
    %257 = arith.addf %254, %256 : vector<1x128xf32>
    %258 = arith.negf %257 : vector<1x128xf32>
    %259 = math.exp %258 : vector<1x128xf32>
    %cst_58 = arith.constant 1.000000e+00 : f32
    %260 = vector.broadcast %cst_58 : f32 to vector<1x128xf32>
    %261 = arith.addf %260, %259 : vector<1x128xf32>
    %262 = arith.divf %260, %261 : vector<1x128xf32>
    %263 = math.tanh %257 : vector<1x128xf32>
    %264 = vector.extract_strided_slice %262 {offsets = [0, 0], sizes = [1, 32], strides = [1, 1]} : vector<1x128xf32> to vector<1x32xf32>
    %265 = vector.extract_strided_slice %262 {offsets = [0, 32], sizes = [1, 32], strides = [1, 1]} : vector<1x128xf32> to vector<1x32xf32>
    %266 = vector.extract_strided_slice %263 {offsets = [0, 64], sizes = [1, 32], strides = [1, 1]} : vector<1x128xf32> to vector<1x32xf32>
    %267 = vector.extract_strided_slice %262 {offsets = [0, 96], sizes = [1, 32], strides = [1, 1]} : vector<1x128xf32> to vector<1x32xf32>
    %268 = arith.mulf %265, %250 : vector<1x32xf32>
    %269 = arith.mulf %264, %266 : vector<1x32xf32>
    %270 = arith.addf %268, %269 : vector<1x32xf32>
    %271 = math.tanh %270 : vector<1x32xf32>
    %272 = arith.mulf %267, %271 : vector<1x32xf32>
    %c4_59 = arith.constant 4 : index
    %c0_60 = arith.constant 0 : index
    %273 = vector.load %arg14[%c4_59, %c0_60] : memref<8x32xf32, #tpu.memory_space<vmem>>, vector<1x32xf32>
    tpu.vector_store %arg14[%c4_59, %c0_60], %272 {strides = array<i32>} : memref<8x32xf32, #tpu.memory_space<vmem>>, vector<1x32xf32>,
    %274 = vector.extract_strided_slice %170 {offsets = [5, 0], sizes = [1, 128], strides = [1, 1]} : vector<8x128xf32> to vector<1x128xf32>
    %275 = arith.truncf %272 : vector<1x32xf32> to vector<1x32xbf16>
    %cst_61 = arith.constant dense<0.000000e+00> : vector<1x128xf32>
    %276 = tpu.matmul %275, %171, %cst_61 {dimension_numbers = #tpu.dot_dimension_numbers<[1], [0], [0], [1], [0, 0, 1, 1], [], []>} : vector<1x32xbf16>, vector<32x128xbf16>, vector<1x128xf32> -> vector<1x128xf32>
    %277 = arith.addf %274, %276 : vector<1x128xf32>
    %278 = arith.negf %277 : vector<1x128xf32>
    %279 = math.exp %278 : vector<1x128xf32>
    %cst_62 = arith.constant 1.000000e+00 : f32
    %280 = vector.broadcast %cst_62 : f32 to vector<1x128xf32>
    %281 = arith.addf %280, %279 : vector<1x128xf32>
    %282 = arith.divf %280, %281 : vector<1x128xf32>
    %283 = math.tanh %277 : vector<1x128xf32>
    %284 = vector.extract_strided_slice %282 {offsets = [0, 0], sizes = [1, 32], strides = [1, 1]} : vector<1x128xf32> to vector<1x32xf32>
    %285 = vector.extract_strided_slice %282 {offsets = [0, 32], sizes = [1, 32], strides = [1, 1]} : vector<1x128xf32> to vector<1x32xf32>
    %286 = vector.extract_strided_slice %283 {offsets = [0, 64], sizes = [1, 32], strides = [1, 1]} : vector<1x128xf32> to vector<1x32xf32>
    %287 = vector.extract_strided_slice %282 {offsets = [0, 96], sizes = [1, 32], strides = [1, 1]} : vector<1x128xf32> to vector<1x32xf32>
    %288 = arith.mulf %285, %270 : vector<1x32xf32>
    %289 = arith.mulf %284, %286 : vector<1x32xf32>
    %290 = arith.addf %288, %289 : vector<1x32xf32>
    %291 = math.tanh %290 : vector<1x32xf32>
    %292 = arith.mulf %287, %291 : vector<1x32xf32>
    %c5_63 = arith.constant 5 : index
    %c0_64 = arith.constant 0 : index
    %293 = vector.load %arg14[%c5_63, %c0_64] : memref<8x32xf32, #tpu.memory_space<vmem>>, vector<1x32xf32>
    tpu.vector_store %arg14[%c5_63, %c0_64], %292 {strides = array<i32>} : memref<8x32xf32, #tpu.memory_space<vmem>>, vector<1x32xf32>,
    %294 = vector.extract_strided_slice %170 {offsets = [6, 0], sizes = [1, 128], strides = [1, 1]} : vector<8x128xf32> to vector<1x128xf32>
    %295 = arith.truncf %292 : vector<1x32xf32> to vector<1x32xbf16>
    %cst_65 = arith.constant dense<0.000000e+00> : vector<1x128xf32>
    %296 = tpu.matmul %295, %171, %cst_65 {dimension_numbers = #tpu.dot_dimension_numbers<[1], [0], [0], [1], [0, 0, 1, 1], [], []>} : vector<1x32xbf16>, vector<32x128xbf16>, vector<1x128xf32> -> vector<1x128xf32>
    %297 = arith.addf %294, %296 : vector<1x128xf32>
    %298 = arith.negf %297 : vector<1x128xf32>
    %299 = math.exp %298 : vector<1x128xf32>
    %cst_66 = arith.constant 1.000000e+00 : f32
    %300 = vector.broadcast %cst_66 : f32 to vector<1x128xf32>
    %301 = arith.addf %300, %299 : vector<1x128xf32>
    %302 = arith.divf %300, %301 : vector<1x128xf32>
    %303 = math.tanh %297 : vector<1x128xf32>
    %304 = vector.extract_strided_slice %302 {offsets = [0, 0], sizes = [1, 32], strides = [1, 1]} : vector<1x128xf32> to vector<1x32xf32>
    %305 = vector.extract_strided_slice %302 {offsets = [0, 32], sizes = [1, 32], strides = [1, 1]} : vector<1x128xf32> to vector<1x32xf32>
    %306 = vector.extract_strided_slice %303 {offsets = [0, 64], sizes = [1, 32], strides = [1, 1]} : vector<1x128xf32> to vector<1x32xf32>
    %307 = vector.extract_strided_slice %302 {offsets = [0, 96], sizes = [1, 32], strides = [1, 1]} : vector<1x128xf32> to vector<1x32xf32>
    %308 = arith.mulf %305, %290 : vector<1x32xf32>
    %309 = arith.mulf %304, %306 : vector<1x32xf32>
    %310 = arith.addf %308, %309 : vector<1x32xf32>
    %311 = math.tanh %310 : vector<1x32xf32>
    %312 = arith.mulf %307, %311 : vector<1x32xf32>
    %c6_67 = arith.constant 6 : index
    %c0_68 = arith.constant 0 : index
    %313 = vector.load %arg14[%c6_67, %c0_68] : memref<8x32xf32, #tpu.memory_space<vmem>>, vector<1x32xf32>
    tpu.vector_store %arg14[%c6_67, %c0_68], %312 {strides = array<i32>} : memref<8x32xf32, #tpu.memory_space<vmem>>, vector<1x32xf32>,
    %314 = vector.extract_strided_slice %170 {offsets = [7, 0], sizes = [1, 128], strides = [1, 1]} : vector<8x128xf32> to vector<1x128xf32>
    %315 = arith.truncf %312 : vector<1x32xf32> to vector<1x32xbf16>
    %cst_69 = arith.constant dense<0.000000e+00> : vector<1x128xf32>
    %316 = tpu.matmul %315, %171, %cst_69 {dimension_numbers = #tpu.dot_dimension_numbers<[1], [0], [0], [1], [0, 0, 1, 1], [], []>} : vector<1x32xbf16>, vector<32x128xbf16>, vector<1x128xf32> -> vector<1x128xf32>
    %317 = arith.addf %314, %316 : vector<1x128xf32>
    %318 = arith.negf %317 : vector<1x128xf32>
    %319 = math.exp %318 : vector<1x128xf32>
    %cst_70 = arith.constant 1.000000e+00 : f32
    %320 = vector.broadcast %cst_70 : f32 to vector<1x128xf32>
    %321 = arith.addf %320, %319 : vector<1x128xf32>
    %322 = arith.divf %320, %321 : vector<1x128xf32>
    %323 = math.tanh %317 : vector<1x128xf32>
    %324 = vector.extract_strided_slice %322 {offsets = [0, 0], sizes = [1, 32], strides = [1, 1]} : vector<1x128xf32> to vector<1x32xf32>
    %325 = vector.extract_strided_slice %322 {offsets = [0, 32], sizes = [1, 32], strides = [1, 1]} : vector<1x128xf32> to vector<1x32xf32>
    %326 = vector.extract_strided_slice %323 {offsets = [0, 64], sizes = [1, 32], strides = [1, 1]} : vector<1x128xf32> to vector<1x32xf32>
    %327 = vector.extract_strided_slice %322 {offsets = [0, 96], sizes = [1, 32], strides = [1, 1]} : vector<1x128xf32> to vector<1x32xf32>
    %328 = arith.mulf %325, %310 : vector<1x32xf32>
    %329 = arith.mulf %324, %326 : vector<1x32xf32>
    %330 = arith.addf %328, %329 : vector<1x32xf32>
    %331 = math.tanh %330 : vector<1x32xf32>
    %332 = arith.mulf %327, %331 : vector<1x32xf32>
    %c7_71 = arith.constant 7 : index
    %c0_72 = arith.constant 0 : index
    %333 = vector.load %arg14[%c7_71, %c0_72] : memref<8x32xf32, #tpu.memory_space<vmem>>, vector<1x32xf32>
    tpu.vector_store %arg14[%c7_71, %c0_72], %332 {strides = array<i32>} : memref<8x32xf32, #tpu.memory_space<vmem>>, vector<1x32xf32>,
    %c0_73 = arith.constant 0 : index
    %c0_74 = arith.constant 0 : index
    %334 = vector.load %arg14[%c0_73, %c0_74] : memref<8x32xf32, #tpu.memory_space<vmem>>, vector<8x32xf32>
    %335 = arith.truncf %334 : vector<8x32xf32> to vector<8x32xbf16>
    %c0_75 = arith.constant 0 : index
    %c0_76 = arith.constant 0 : index
    %336 = vector.load %arg5[%c0_75, %c0_76] : memref<32x128xbf16, #tpu.memory_space<vmem>>, vector<32x128xbf16>
    %cst_77 = arith.constant dense<0.000000e+00> : vector<8x128xf32>
    %337 = tpu.matmul %335, %336, %cst_77 {dimension_numbers = #tpu.dot_dimension_numbers<[1], [0], [0], [1], [0, 0, 1, 1], [], []>} : vector<8x32xbf16>, vector<32x128xbf16>, vector<8x128xf32> -> vector<8x128xf32>
    %c0_78 = arith.constant 0 : index
    %c0_79 = arith.constant 0 : index
    %338 = vector.load %arg6[%c0_78, %c0_79] : memref<32x128xbf16, #tpu.memory_space<vmem>>, vector<32x128xbf16>
    %cst_80 = arith.constant 0.000000e+00 : f32
    %339 = vector.broadcast %cst_80 : f32 to vector<1x32xf32>
    %cst_81 = arith.constant 0.000000e+00 : f32
    %340 = vector.broadcast %cst_81 : f32 to vector<1x32xf32>
    %341 = vector.extract_strided_slice %337 {offsets = [0, 0], sizes = [1, 128], strides = [1, 1]} : vector<8x128xf32> to vector<1x128xf32>
    %342 = arith.truncf %339 : vector<1x32xf32> to vector<1x32xbf16>
    %cst_82 = arith.constant dense<0.000000e+00> : vector<1x128xf32>
    %343 = tpu.matmul %342, %338, %cst_82 {dimension_numbers = #tpu.dot_dimension_numbers<[1], [0], [0], [1], [0, 0, 1, 1], [], []>} : vector<1x32xbf16>, vector<32x128xbf16>, vector<1x128xf32> -> vector<1x128xf32>
    %344 = arith.addf %341, %343 : vector<1x128xf32>
    %345 = arith.negf %344 : vector<1x128xf32>
    %346 = math.exp %345 : vector<1x128xf32>
    %cst_83 = arith.constant 1.000000e+00 : f32
    %347 = vector.broadcast %cst_83 : f32 to vector<1x128xf32>
    %348 = arith.addf %347, %346 : vector<1x128xf32>
    %349 = arith.divf %347, %348 : vector<1x128xf32>
    %350 = math.tanh %344 : vector<1x128xf32>
    %351 = vector.extract_strided_slice %349 {offsets = [0, 0], sizes = [1, 32], strides = [1, 1]} : vector<1x128xf32> to vector<1x32xf32>
    %352 = vector.extract_strided_slice %349 {offsets = [0, 32], sizes = [1, 32], strides = [1, 1]} : vector<1x128xf32> to vector<1x32xf32>
    %353 = vector.extract_strided_slice %350 {offsets = [0, 64], sizes = [1, 32], strides = [1, 1]} : vector<1x128xf32> to vector<1x32xf32>
    %354 = vector.extract_strided_slice %349 {offsets = [0, 96], sizes = [1, 32], strides = [1, 1]} : vector<1x128xf32> to vector<1x32xf32>
    %355 = arith.mulf %352, %340 : vector<1x32xf32>
    %356 = arith.mulf %351, %353 : vector<1x32xf32>
    %357 = arith.addf %355, %356 : vector<1x32xf32>
    %358 = math.tanh %357 : vector<1x32xf32>
    %359 = arith.mulf %354, %358 : vector<1x32xf32>
    %c0_84 = arith.constant 0 : index
    %c0_85 = arith.constant 0 : index
    %360 = vector.load %arg14[%c0_84, %c0_85] : memref<8x32xf32, #tpu.memory_space<vmem>>, vector<1x32xf32>
    tpu.vector_store %arg14[%c0_84, %c0_85], %359 {strides = array<i32>} : memref<8x32xf32, #tpu.memory_space<vmem>>, vector<1x32xf32>,
    %361 = vector.extract_strided_slice %337 {offsets = [1, 0], sizes = [1, 128], strides = [1, 1]} : vector<8x128xf32> to vector<1x128xf32>
    %362 = arith.truncf %359 : vector<1x32xf32> to vector<1x32xbf16>
    %cst_86 = arith.constant dense<0.000000e+00> : vector<1x128xf32>
    %363 = tpu.matmul %362, %338, %cst_86 {dimension_numbers = #tpu.dot_dimension_numbers<[1], [0], [0], [1], [0, 0, 1, 1], [], []>} : vector<1x32xbf16>, vector<32x128xbf16>, vector<1x128xf32> -> vector<1x128xf32>
    %364 = arith.addf %361, %363 : vector<1x128xf32>
    %365 = arith.negf %364 : vector<1x128xf32>
    %366 = math.exp %365 : vector<1x128xf32>
    %cst_87 = arith.constant 1.000000e+00 : f32
    %367 = vector.broadcast %cst_87 : f32 to vector<1x128xf32>
    %368 = arith.addf %367, %366 : vector<1x128xf32>
    %369 = arith.divf %367, %368 : vector<1x128xf32>
    %370 = math.tanh %364 : vector<1x128xf32>
    %371 = vector.extract_strided_slice %369 {offsets = [0, 0], sizes = [1, 32], strides = [1, 1]} : vector<1x128xf32> to vector<1x32xf32>
    %372 = vector.extract_strided_slice %369 {offsets = [0, 32], sizes = [1, 32], strides = [1, 1]} : vector<1x128xf32> to vector<1x32xf32>
    %373 = vector.extract_strided_slice %370 {offsets = [0, 64], sizes = [1, 32], strides = [1, 1]} : vector<1x128xf32> to vector<1x32xf32>
    %374 = vector.extract_strided_slice %369 {offsets = [0, 96], sizes = [1, 32], strides = [1, 1]} : vector<1x128xf32> to vector<1x32xf32>
    %375 = arith.mulf %372, %357 : vector<1x32xf32>
    %376 = arith.mulf %371, %373 : vector<1x32xf32>
    %377 = arith.addf %375, %376 : vector<1x32xf32>
    %378 = math.tanh %377 : vector<1x32xf32>
    %379 = arith.mulf %374, %378 : vector<1x32xf32>
    %c1_88 = arith.constant 1 : index
    %c0_89 = arith.constant 0 : index
    %380 = vector.load %arg14[%c1_88, %c0_89] : memref<8x32xf32, #tpu.memory_space<vmem>>, vector<1x32xf32>
    tpu.vector_store %arg14[%c1_88, %c0_89], %379 {strides = array<i32>} : memref<8x32xf32, #tpu.memory_space<vmem>>, vector<1x32xf32>,
    %381 = vector.extract_strided_slice %337 {offsets = [2, 0], sizes = [1, 128], strides = [1, 1]} : vector<8x128xf32> to vector<1x128xf32>
    %382 = arith.truncf %379 : vector<1x32xf32> to vector<1x32xbf16>
    %cst_90 = arith.constant dense<0.000000e+00> : vector<1x128xf32>
    %383 = tpu.matmul %382, %338, %cst_90 {dimension_numbers = #tpu.dot_dimension_numbers<[1], [0], [0], [1], [0, 0, 1, 1], [], []>} : vector<1x32xbf16>, vector<32x128xbf16>, vector<1x128xf32> -> vector<1x128xf32>
    %384 = arith.addf %381, %383 : vector<1x128xf32>
    %385 = arith.negf %384 : vector<1x128xf32>
    %386 = math.exp %385 : vector<1x128xf32>
    %cst_91 = arith.constant 1.000000e+00 : f32
    %387 = vector.broadcast %cst_91 : f32 to vector<1x128xf32>
    %388 = arith.addf %387, %386 : vector<1x128xf32>
    %389 = arith.divf %387, %388 : vector<1x128xf32>
    %390 = math.tanh %384 : vector<1x128xf32>
    %391 = vector.extract_strided_slice %389 {offsets = [0, 0], sizes = [1, 32], strides = [1, 1]} : vector<1x128xf32> to vector<1x32xf32>
    %392 = vector.extract_strided_slice %389 {offsets = [0, 32], sizes = [1, 32], strides = [1, 1]} : vector<1x128xf32> to vector<1x32xf32>
    %393 = vector.extract_strided_slice %390 {offsets = [0, 64], sizes = [1, 32], strides = [1, 1]} : vector<1x128xf32> to vector<1x32xf32>
    %394 = vector.extract_strided_slice %389 {offsets = [0, 96], sizes = [1, 32], strides = [1, 1]} : vector<1x128xf32> to vector<1x32xf32>
    %395 = arith.mulf %392, %377 : vector<1x32xf32>
    %396 = arith.mulf %391, %393 : vector<1x32xf32>
    %397 = arith.addf %395, %396 : vector<1x32xf32>
    %398 = math.tanh %397 : vector<1x32xf32>
    %399 = arith.mulf %394, %398 : vector<1x32xf32>
    %c2_92 = arith.constant 2 : index
    %c0_93 = arith.constant 0 : index
    %400 = vector.load %arg14[%c2_92, %c0_93] : memref<8x32xf32, #tpu.memory_space<vmem>>, vector<1x32xf32>
    tpu.vector_store %arg14[%c2_92, %c0_93], %399 {strides = array<i32>} : memref<8x32xf32, #tpu.memory_space<vmem>>, vector<1x32xf32>,
    %401 = vector.extract_strided_slice %337 {offsets = [3, 0], sizes = [1, 128], strides = [1, 1]} : vector<8x128xf32> to vector<1x128xf32>
    %402 = arith.truncf %399 : vector<1x32xf32> to vector<1x32xbf16>
    %cst_94 = arith.constant dense<0.000000e+00> : vector<1x128xf32>
    %403 = tpu.matmul %402, %338, %cst_94 {dimension_numbers = #tpu.dot_dimension_numbers<[1], [0], [0], [1], [0, 0, 1, 1], [], []>} : vector<1x32xbf16>, vector<32x128xbf16>, vector<1x128xf32> -> vector<1x128xf32>
    %404 = arith.addf %401, %403 : vector<1x128xf32>
    %405 = arith.negf %404 : vector<1x128xf32>
    %406 = math.exp %405 : vector<1x128xf32>
    %cst_95 = arith.constant 1.000000e+00 : f32
    %407 = vector.broadcast %cst_95 : f32 to vector<1x128xf32>
    %408 = arith.addf %407, %406 : vector<1x128xf32>
    %409 = arith.divf %407, %408 : vector<1x128xf32>
    %410 = math.tanh %404 : vector<1x128xf32>
    %411 = vector.extract_strided_slice %409 {offsets = [0, 0], sizes = [1, 32], strides = [1, 1]} : vector<1x128xf32> to vector<1x32xf32>
    %412 = vector.extract_strided_slice %409 {offsets = [0, 32], sizes = [1, 32], strides = [1, 1]} : vector<1x128xf32> to vector<1x32xf32>
    %413 = vector.extract_strided_slice %410 {offsets = [0, 64], sizes = [1, 32], strides = [1, 1]} : vector<1x128xf32> to vector<1x32xf32>
    %414 = vector.extract_strided_slice %409 {offsets = [0, 96], sizes = [1, 32], strides = [1, 1]} : vector<1x128xf32> to vector<1x32xf32>
    %415 = arith.mulf %412, %397 : vector<1x32xf32>
    %416 = arith.mulf %411, %413 : vector<1x32xf32>
    %417 = arith.addf %415, %416 : vector<1x32xf32>
    %418 = math.tanh %417 : vector<1x32xf32>
    %419 = arith.mulf %414, %418 : vector<1x32xf32>
    %c3_96 = arith.constant 3 : index
    %c0_97 = arith.constant 0 : index
    %420 = vector.load %arg14[%c3_96, %c0_97] : memref<8x32xf32, #tpu.memory_space<vmem>>, vector<1x32xf32>
    tpu.vector_store %arg14[%c3_96, %c0_97], %419 {strides = array<i32>} : memref<8x32xf32, #tpu.memory_space<vmem>>, vector<1x32xf32>,
    %421 = vector.extract_strided_slice %337 {offsets = [4, 0], sizes = [1, 128], strides = [1, 1]} : vector<8x128xf32> to vector<1x128xf32>
    %422 = arith.truncf %419 : vector<1x32xf32> to vector<1x32xbf16>
    %cst_98 = arith.constant dense<0.000000e+00> : vector<1x128xf32>
    %423 = tpu.matmul %422, %338, %cst_98 {dimension_numbers = #tpu.dot_dimension_numbers<[1], [0], [0], [1], [0, 0, 1, 1], [], []>} : vector<1x32xbf16>, vector<32x128xbf16>, vector<1x128xf32> -> vector<1x128xf32>
    %424 = arith.addf %421, %423 : vector<1x128xf32>
    %425 = arith.negf %424 : vector<1x128xf32>
    %426 = math.exp %425 : vector<1x128xf32>
    %cst_99 = arith.constant 1.000000e+00 : f32
    %427 = vector.broadcast %cst_99 : f32 to vector<1x128xf32>
    %428 = arith.addf %427, %426 : vector<1x128xf32>
    %429 = arith.divf %427, %428 : vector<1x128xf32>
    %430 = math.tanh %424 : vector<1x128xf32>
    %431 = vector.extract_strided_slice %429 {offsets = [0, 0], sizes = [1, 32], strides = [1, 1]} : vector<1x128xf32> to vector<1x32xf32>
    %432 = vector.extract_strided_slice %429 {offsets = [0, 32], sizes = [1, 32], strides = [1, 1]} : vector<1x128xf32> to vector<1x32xf32>
    %433 = vector.extract_strided_slice %430 {offsets = [0, 64], sizes = [1, 32], strides = [1, 1]} : vector<1x128xf32> to vector<1x32xf32>
    %434 = vector.extract_strided_slice %429 {offsets = [0, 96], sizes = [1, 32], strides = [1, 1]} : vector<1x128xf32> to vector<1x32xf32>
    %435 = arith.mulf %432, %417 : vector<1x32xf32>
    %436 = arith.mulf %431, %433 : vector<1x32xf32>
    %437 = arith.addf %435, %436 : vector<1x32xf32>
    %438 = math.tanh %437 : vector<1x32xf32>
    %439 = arith.mulf %434, %438 : vector<1x32xf32>
    %c4_100 = arith.constant 4 : index
    %c0_101 = arith.constant 0 : index
    %440 = vector.load %arg14[%c4_100, %c0_101] : memref<8x32xf32, #tpu.memory_space<vmem>>, vector<1x32xf32>
    tpu.vector_store %arg14[%c4_100, %c0_101], %439 {strides = array<i32>} : memref<8x32xf32, #tpu.memory_space<vmem>>, vector<1x32xf32>,
    %441 = vector.extract_strided_slice %337 {offsets = [5, 0], sizes = [1, 128], strides = [1, 1]} : vector<8x128xf32> to vector<1x128xf32>
    %442 = arith.truncf %439 : vector<1x32xf32> to vector<1x32xbf16>
    %cst_102 = arith.constant dense<0.000000e+00> : vector<1x128xf32>
    %443 = tpu.matmul %442, %338, %cst_102 {dimension_numbers = #tpu.dot_dimension_numbers<[1], [0], [0], [1], [0, 0, 1, 1], [], []>} : vector<1x32xbf16>, vector<32x128xbf16>, vector<1x128xf32> -> vector<1x128xf32>
    %444 = arith.addf %441, %443 : vector<1x128xf32>
    %445 = arith.negf %444 : vector<1x128xf32>
    %446 = math.exp %445 : vector<1x128xf32>
    %cst_103 = arith.constant 1.000000e+00 : f32
    %447 = vector.broadcast %cst_103 : f32 to vector<1x128xf32>
    %448 = arith.addf %447, %446 : vector<1x128xf32>
    %449 = arith.divf %447, %448 : vector<1x128xf32>
    %450 = math.tanh %444 : vector<1x128xf32>
    %451 = vector.extract_strided_slice %449 {offsets = [0, 0], sizes = [1, 32], strides = [1, 1]} : vector<1x128xf32> to vector<1x32xf32>
    %452 = vector.extract_strided_slice %449 {offsets = [0, 32], sizes = [1, 32], strides = [1, 1]} : vector<1x128xf32> to vector<1x32xf32>
    %453 = vector.extract_strided_slice %450 {offsets = [0, 64], sizes = [1, 32], strides = [1, 1]} : vector<1x128xf32> to vector<1x32xf32>
    %454 = vector.extract_strided_slice %449 {offsets = [0, 96], sizes = [1, 32], strides = [1, 1]} : vector<1x128xf32> to vector<1x32xf32>
    %455 = arith.mulf %452, %437 : vector<1x32xf32>
    %456 = arith.mulf %451, %453 : vector<1x32xf32>
    %457 = arith.addf %455, %456 : vector<1x32xf32>
    %458 = math.tanh %457 : vector<1x32xf32>
    %459 = arith.mulf %454, %458 : vector<1x32xf32>
    %c5_104 = arith.constant 5 : index
    %c0_105 = arith.constant 0 : index
    %460 = vector.load %arg14[%c5_104, %c0_105] : memref<8x32xf32, #tpu.memory_space<vmem>>, vector<1x32xf32>
    tpu.vector_store %arg14[%c5_104, %c0_105], %459 {strides = array<i32>} : memref<8x32xf32, #tpu.memory_space<vmem>>, vector<1x32xf32>,
    %461 = vector.extract_strided_slice %337 {offsets = [6, 0], sizes = [1, 128], strides = [1, 1]} : vector<8x128xf32> to vector<1x128xf32>
    %462 = arith.truncf %459 : vector<1x32xf32> to vector<1x32xbf16>
    %cst_106 = arith.constant dense<0.000000e+00> : vector<1x128xf32>
    %463 = tpu.matmul %462, %338, %cst_106 {dimension_numbers = #tpu.dot_dimension_numbers<[1], [0], [0], [1], [0, 0, 1, 1], [], []>} : vector<1x32xbf16>, vector<32x128xbf16>, vector<1x128xf32> -> vector<1x128xf32>
    %464 = arith.addf %461, %463 : vector<1x128xf32>
    %465 = arith.negf %464 : vector<1x128xf32>
    %466 = math.exp %465 : vector<1x128xf32>
    %cst_107 = arith.constant 1.000000e+00 : f32
    %467 = vector.broadcast %cst_107 : f32 to vector<1x128xf32>
    %468 = arith.addf %467, %466 : vector<1x128xf32>
    %469 = arith.divf %467, %468 : vector<1x128xf32>
    %470 = math.tanh %464 : vector<1x128xf32>
    %471 = vector.extract_strided_slice %469 {offsets = [0, 0], sizes = [1, 32], strides = [1, 1]} : vector<1x128xf32> to vector<1x32xf32>
    %472 = vector.extract_strided_slice %469 {offsets = [0, 32], sizes = [1, 32], strides = [1, 1]} : vector<1x128xf32> to vector<1x32xf32>
    %473 = vector.extract_strided_slice %470 {offsets = [0, 64], sizes = [1, 32], strides = [1, 1]} : vector<1x128xf32> to vector<1x32xf32>
    %474 = vector.extract_strided_slice %469 {offsets = [0, 96], sizes = [1, 32], strides = [1, 1]} : vector<1x128xf32> to vector<1x32xf32>
    %475 = arith.mulf %472, %457 : vector<1x32xf32>
    %476 = arith.mulf %471, %473 : vector<1x32xf32>
    %477 = arith.addf %475, %476 : vector<1x32xf32>
    %478 = math.tanh %477 : vector<1x32xf32>
    %479 = arith.mulf %474, %478 : vector<1x32xf32>
    %c6_108 = arith.constant 6 : index
    %c0_109 = arith.constant 0 : index
    %480 = vector.load %arg14[%c6_108, %c0_109] : memref<8x32xf32, #tpu.memory_space<vmem>>, vector<1x32xf32>
    tpu.vector_store %arg14[%c6_108, %c0_109], %479 {strides = array<i32>} : memref<8x32xf32, #tpu.memory_space<vmem>>, vector<1x32xf32>,
    %481 = vector.extract_strided_slice %337 {offsets = [7, 0], sizes = [1, 128], strides = [1, 1]} : vector<8x128xf32> to vector<1x128xf32>
    %482 = arith.truncf %479 : vector<1x32xf32> to vector<1x32xbf16>
    %cst_110 = arith.constant dense<0.000000e+00> : vector<1x128xf32>
    %483 = tpu.matmul %482, %338, %cst_110 {dimension_numbers = #tpu.dot_dimension_numbers<[1], [0], [0], [1], [0, 0, 1, 1], [], []>} : vector<1x32xbf16>, vector<32x128xbf16>, vector<1x128xf32> -> vector<1x128xf32>
    %484 = arith.addf %481, %483 : vector<1x128xf32>
    %485 = arith.negf %484 : vector<1x128xf32>
    %486 = math.exp %485 : vector<1x128xf32>
    %cst_111 = arith.constant 1.000000e+00 : f32
    %487 = vector.broadcast %cst_111 : f32 to vector<1x128xf32>
    %488 = arith.addf %487, %486 : vector<1x128xf32>
    %489 = arith.divf %487, %488 : vector<1x128xf32>
    %490 = math.tanh %484 : vector<1x128xf32>
    %491 = vector.extract_strided_slice %489 {offsets = [0, 0], sizes = [1, 32], strides = [1, 1]} : vector<1x128xf32> to vector<1x32xf32>
    %492 = vector.extract_strided_slice %489 {offsets = [0, 32], sizes = [1, 32], strides = [1, 1]} : vector<1x128xf32> to vector<1x32xf32>
    %493 = vector.extract_strided_slice %490 {offsets = [0, 64], sizes = [1, 32], strides = [1, 1]} : vector<1x128xf32> to vector<1x32xf32>
    %494 = vector.extract_strided_slice %489 {offsets = [0, 96], sizes = [1, 32], strides = [1, 1]} : vector<1x128xf32> to vector<1x32xf32>
    %495 = arith.mulf %492, %477 : vector<1x32xf32>
    %496 = arith.mulf %491, %493 : vector<1x32xf32>
    %497 = arith.addf %495, %496 : vector<1x32xf32>
    %498 = math.tanh %497 : vector<1x32xf32>
    %499 = arith.mulf %494, %498 : vector<1x32xf32>
    %c7_112 = arith.constant 7 : index
    %c0_113 = arith.constant 0 : index
    %500 = vector.load %arg14[%c7_112, %c0_113] : memref<8x32xf32, #tpu.memory_space<vmem>>, vector<1x32xf32>
    tpu.vector_store %arg14[%c7_112, %c0_113], %499 {strides = array<i32>} : memref<8x32xf32, #tpu.memory_space<vmem>>, vector<1x32xf32>,
    %c0_114 = arith.constant 0 : index
    %c0_115 = arith.constant 0 : index
    %501 = vector.load %arg14[%c0_114, %c0_115] : memref<8x32xf32, #tpu.memory_space<vmem>>, vector<8x32xf32>
    %c0_116 = arith.constant 0 : index
    %c0_117 = arith.constant 0 : index
    %502 = vector.load %arg7[%c0_116, %c0_117] : memref<32x32xbf16, #tpu.memory_space<vmem>>, vector<32x32xbf16>
    %c0_118 = arith.constant 0 : index
    %c0_119 = arith.constant 0 : index
    %503 = vector.load %arg8[%c0_118, %c0_119] : memref<1x32xf32, #tpu.memory_space<vmem>>, vector<1x32xf32>
    %504 = arith.truncf %501 : vector<8x32xf32> to vector<8x32xbf16>
    %cst_120 = arith.constant dense<0.000000e+00> : vector<8x32xf32>
    %505 = tpu.matmul %504, %502, %cst_120 {dimension_numbers = #tpu.dot_dimension_numbers<[1], [0], [0], [1], [0, 0, 1, 1], [], []>} : vector<8x32xbf16>, vector<32x32xbf16>, vector<8x32xf32> -> vector<8x32xf32>
    %506 = vector.broadcast %503 : vector<1x32xf32> to vector<8x32xf32>
    %507 = arith.addf %505, %506 : vector<8x32xf32>
    %508 = arith.truncf %507 : vector<8x32xf32> to vector<8x32xbf16>
    %cst_121 = arith.constant dense<0.000000e+00> : vector<8x32xf32>
    %509 = tpu.matmul %508, %502, %cst_121 {dimension_numbers = #tpu.dot_dimension_numbers<[1], [0], [0], [1], [0, 0, 1, 1], [], []>} : vector<8x32xbf16>, vector<32x32xbf16>, vector<8x32xf32> -> vector<8x32xf32>
    %510 = vector.broadcast %503 : vector<1x32xf32> to vector<8x32xf32>
    %511 = arith.addf %509, %510 : vector<8x32xf32>
    %cst_122 = arith.constant 0.000000e+00 : f32
    %512 = vector.broadcast %cst_122 : f32 to vector<8x32xf32>
    %513 = arith.maximumf %511, %512 : vector<8x32xf32>
    %514 = arith.truncf %513 : vector<8x32xf32> to vector<8x32xbf16>
    %c0_123 = arith.constant 0 : index
    %c0_124 = arith.constant 0 : index
    %515 = vector.load %arg9[%c0_123, %c0_124] : memref<32x32xbf16, #tpu.memory_space<vmem>>, vector<32x32xbf16>
    %cst_125 = arith.constant dense<0.000000e+00> : vector<8x32xf32>
    %516 = tpu.matmul %514, %515, %cst_125 {dimension_numbers = #tpu.dot_dimension_numbers<[1], [0], [0], [1], [0, 0, 1, 1], [], []>} : vector<8x32xbf16>, vector<32x32xbf16>, vector<8x32xf32> -> vector<8x32xf32>
    %c0_126 = arith.constant 0 : index
    %c0_127 = arith.constant 0 : index
    %517 = vector.load %arg10[%c0_126, %c0_127] : memref<1x32xf32, #tpu.memory_space<vmem>>, vector<1x32xf32>
    %518 = vector.broadcast %517 : vector<1x32xf32> to vector<8x32xf32>
    %519 = arith.addf %516, %518 : vector<8x32xf32>
    %cst_128 = arith.constant 0.000000e+00 : f32
    %520 = vector.broadcast %cst_128 : f32 to vector<8x32xf32>
    %521 = arith.maximumf %519, %520 : vector<8x32xf32>
    %522 = arith.truncf %521 : vector<8x32xf32> to vector<8x32xbf16>
    %c0_129 = arith.constant 0 : index
    %c0_130 = arith.constant 0 : index
    %523 = vector.load %arg11[%c0_129, %c0_130] : memref<32x1xbf16, #tpu.memory_space<vmem>>, vector<32x1xbf16>
    %cst_131 = arith.constant dense<0.000000e+00> : vector<8x1xf32>
    %524 = tpu.matmul %522, %523, %cst_131 {dimension_numbers = #tpu.dot_dimension_numbers<[1], [0], [0], [1], [0, 0, 1, 1], [], []>} : vector<8x32xbf16>, vector<32x1xbf16>, vector<8x1xf32> -> vector<8x1xf32>
    %c0_132 = arith.constant 0 : index
    %c0_133 = arith.constant 0 : index
    %525 = vector.load %arg12[%c0_132, %c0_133] : memref<1x1xf32, #tpu.memory_space<vmem>>, vector<1x1xf32>
    %526 = vector.broadcast %525 : vector<1x1xf32> to vector<8x1xf32>
    %527 = arith.addf %524, %526 : vector<8x1xf32>
    %cst_134 = arith.constant 0.000000e+00 : f32
    %528 = vector.broadcast %cst_134 : f32 to vector<8x1xf32>
    %529 = arith.maximumf %527, %528 : vector<8x1xf32>
    %c0_135 = arith.constant 0 : index
    %c0_136 = arith.constant 0 : index
    %530 = vector.load %arg13[%c0_135, %c0_136] : memref<8x1xf32, #tpu.memory_space<vmem>>, vector<8x1xf32>
    tpu.vector_store %arg13[%c0_135, %c0_136], %529 {strides = array<i32>} : memref<8x1xf32, #tpu.memory_space<vmem>>, vector<8x1xf32>,
    return
  }
}

</mosaic_0001>

<bundles_post_ra>
// kernel: lstm_reg_forward.1
= control target key start
LH: loop header
LB: loop body
LE: loop exit
PB: predicated region body
PF: predicated region fallthrough
CT: control target
= control target key end

     0   :  { %s4005_s0 = inlined_call_operand.vmem [shape: f32[8,8], index: 0, kind: input, shape index: {}]   ;;  %s4006_s1 = inlined_call_operand.vmem [shape: bf16[8,128], index: 1, kind: input, shape index: {}]   ;;  %s4007_s2 = inlined_call_operand.vmem [shape: bf16[32,128], index: 2, kind: input, shape index: {}]   ;;  %s4008_s3 = inlined_call_operand.vmem [shape: bf16[32,128], index: 3, kind: input, shape index: {}]   ;;  %s4009_s4 = inlined_call_operand.vmem [shape: bf16[32,128], index: 4, kind: input, shape index: {}]   ;;  %s4010_s5 = inlined_call_operand.vmem [shape: bf16[32,128], index: 5, kind: input, shape index: {}]   ;;  %s4011_s6 = inlined_call_operand.hbm [shape: bf16[32,128], index: 6, kind: input, shape index: {}]   ;;  %s4012_s7 = inlined_call_operand.hbm [shape: bf16[32,32], index: 7, kind: input, shape index: {}]   ;;  %s4013_s8 = inlined_call_operand.hbm [shape: f32[1,32], index: 8, kind: input, shape index: {}]   ;;  %s4014_s9 = inlined_call_operand.hbm [shape: bf16[32,32], index: 9, kind: input, shape index: {}]   ;;  %s4015_s10 = inlined_call_operand.hbm [shape: f32[1,32], index: 10, kind: input, shape index: {}]   ;;  %s4016_s11 = inlined_call_operand.vmem [shape: bf16[32,1], index: 11, kind: input, shape index: {}]   ;;  %s4017_s12 = inlined_call_operand.<no memory space> [shape: f32[1,1], index: 12, kind: input, shape index: {}]   ;;  %s4018_s13 = inlined_call_operand.vmem [shape: f32[8,1], index: 13, kind: output, shape index: {}]  }
   0x1   :  { %v18_v0 = vstv %s4017_s12 }
   0x2   :  { %19 = vst [vmem:[#allocation3] sm:$0x1] %v18_v0 }
   0x3   :  { %20 = vsyncpa [#allocation5], 0 }
   0x4   :  { %21 = vsyncpa [#allocation7], 0 }
   0x5   :  { %22 = vsyncpa [#allocation10], 0  ;;  %s3332_s27 = smov [#allocation6]   ;;  %s3333_s29 = smov [#allocation9]  }
   0x6   :  { %s52_s28 = sshll.u32 %s3332_s27, 4  ;;  %s74_s30 = sshll.u32 %s3333_s29, 4  ;;  %s53_s28 = int_to_ptr.vmem [resolvable:$true] %s52_s28  ;;  %s3416_s30 = int_to_ptr.vmem [resolvable:$true] %s74_s30 }
   0x7   :  { %s3216_s16 = scalar_lea.hbm %s4012_s7, 256 }
   0x8   :  { %p3217_p0 = scmp.ne.s32.totalorder %s4012_s7, %s3216_s16  ;;  %p3220_p1 = scmp.lt.u32.totalorder %s3216_s16, %s4012_s7 }
   0xa   :  { %p3222_p2 = pnand %p3220_p1, %p3217_p0 }
   0xc   :  { %3225 = shalt.err (!%p3222_p2)
}
   0xd   :  { %s3226_s20 = scalar_lea.vmem %s53_s28, 256  ;;  %p3231_p4 = scmp.lt.s32.totalorder %s53_s28, %s53_s28 }
   0xe   :  { %p3227_p3 = scmp.ne.s32.totalorder %s53_s28, %s3226_s20  ;;  %p3232_p5 = scmp.lt.s32.totalorder %s3226_s20, %s3226_s20 }
  0x10   :  { %p3233_p6 = por %p3232_p5, %p3231_p4 }
  0x12   :  { %p3234_p7 = pnand %p3233_p6, %p3227_p3 }
  0x14   :  { %3237 = shalt.err (!%p3234_p7)
}
  0x15   :  { %s3334_s21 = smov 64   ;;  %s3335_s22 = smov 4  }
  0x16   :  { %58 = dma.hbm_to_vmem [thread:$0]  %s4012_s7, 256, %s53_s28, [#allocation7], %s3334_s21, %s3334_s21, %s3335_s22  }
  0x17   :  { %s3238_s27 = scalar_lea.hbm %s4014_s9, 256 }
  0x18   :  { %p3239_p8 = scmp.ne.s32.totalorder %s4014_s9, %s3238_s27  ;;  %p3242_p9 = scmp.lt.u32.totalorder %s3238_s27, %s4014_s9 }
  0x1a   :  { %p3244_p10 = pnand %p3242_p9, %p3239_p8 }
  0x1c   :  { %3247 = shalt.err (!%p3244_p10)
}
  0x1d   :  { %s3248_s17 = scalar_lea.vmem %s3416_s30, 256  ;;  %p3253_p12 = scmp.lt.s32.totalorder %s3416_s30, %s3416_s30 }
  0x1e   :  { %p3249_p11 = scmp.ne.s32.totalorder %s3416_s30, %s3248_s17  ;;  %p3254_p13 = scmp.lt.s32.totalorder %s3248_s17, %s3248_s17 }
  0x20   :  { %p3255_p0 = por %p3254_p13, %p3253_p12 }
  0x22   :  { %p3256_p1 = pnand %p3255_p0, %p3249_p11 }
  0x24   :  { %3259 = shalt.err (!%p3256_p1)
}
  0x25   :  { %80 = dma.hbm_to_vmem [thread:$0]  %s4014_s9, 256, %s3416_s30, [#allocation10], %s3334_s21, %s3334_s21, %s3335_s22  }
  0x26   :  { %s3336_s18 = smov [#allocation4]   ;;  %s3337_s19 = smov [#allocation8]  }
  0x27   :  { %s40_s12 = sshll.u32 %s3336_s18, 4  ;;  %s65_s20 = sshll.u32 %s3337_s19, 4  ;;  %s41_s12 = int_to_ptr.vmem [resolvable:$true] %s40_s12  ;;  %s66_s20 = int_to_ptr.vmem [resolvable:$true] %s65_s20 }
  0x28   :  { %s3260_s25 = scalar_lea.hbm %s4011_s6, 256 }
  0x29   :  { %p3261_p2 = scmp.ne.s32.totalorder %s4011_s6, %s3260_s25  ;;  %p3264_p3 = scmp.lt.u32.totalorder %s3260_s25, %s4011_s6 }
  0x2b   :  { %p3266_p4 = pnand %p3264_p3, %p3261_p2 }
  0x2d   :  { %3269 = shalt.err (!%p3266_p4)
}
  0x2e   :  { %s3270_s9 = scalar_lea.vmem %s41_s12, 256  ;;  %p3275_p6 = scmp.lt.s32.totalorder %s41_s12, %s41_s12 }
  0x2f   :  { %p3271_p5 = scmp.ne.s32.totalorder %s41_s12, %s3270_s9  ;;  %p3276_p7 = scmp.lt.s32.totalorder %s3270_s9, %s3270_s9 }
  0x31   :  { %p3277_p8 = por %p3276_p7, %p3275_p6 }
  0x33   :  { %p3278_p9 = pnand %p3277_p8, %p3271_p5 }
  0x35   :  { %3281 = shalt.err (!%p3278_p9)
}
  0x36   :  { %46 = dma.hbm_to_vmem [thread:$0]  %s4011_s6, 256, %s41_s12, [#allocation5], %s3334_s21, %s3334_s21, %s3335_s22  }
  0x37   :  { %s3282_s7 = scalar_lea.hbm %s4013_s8, 16 }
  0x38   :  { %p3283_p10 = scmp.ne.s32.totalorder %s4013_s8, %s3282_s7  ;;  %p3286_p11 = scmp.lt.u32.totalorder %s3282_s7, %s4013_s8 }
  0x3a   :  { %p3288_p12 = pnand %p3286_p11, %p3283_p10 }
  0x3c   :  { %3291 = shalt.err (!%p3288_p12)
}
  0x3d   :  { %s3292_s24 = scalar_lea.vmem %s66_s20, 16  ;;  %s3296_s25 = scalar_lea.vmem %s66_s20, 32 }
  0x3e   :  { %p3293_p13 = scmp.ne.s32.totalorder %s66_s20, %s3292_s24  ;;  %p3297_p0 = scmp.lt.s32.totalorder %s66_s20, %s66_s20 }
  0x3f   :  { %p3298_p1 = scmp.lt.s32.totalorder %s3296_s25, %s3292_s24 }
  0x41   :  { %p3299_p2 = por %p3298_p1, %p3297_p0 }
  0x43   :  { %p3300_p3 = pnand %p3299_p2, %p3293_p13 }
  0x45   :  { %3303 = shalt.err (!%p3300_p3)
}
  0x46   :  { %68 = dma.hbm_to_vmem [thread:$0]  %s4013_s8, 16, %s66_s20, [#allocation7]  }
  0x47   :  { %s3338_s12 = smov [#allocation11]   ;;  %s3304_s14 = scalar_lea.hbm %s4015_s10, 16 }
  0x48   :  { %s87_s26 = sshll.u32 %s3338_s12, 4  ;;  %p3305_p4 = scmp.ne.s32.totalorder %s4015_s10, %s3304_s14  ;;  %s88_s26 = int_to_ptr.vmem [resolvable:$true] %s87_s26 }
  0x49   :  { %p3308_p5 = scmp.lt.u32.totalorder %s3304_s14, %s4015_s10 }
  0x4b   :  { %p3310_p6 = pnand %p3308_p5, %p3305_p4 }
  0x4d   :  { %3313 = shalt.err (!%p3310_p6)
}
  0x4e   :  { %s3314_s17 = scalar_lea.vmem %s88_s26, 16  ;;  %s3318_s8 = scalar_lea.vmem %s88_s26, 32 }
  0x4f   :  { %p3315_p7 = scmp.ne.s32.totalorder %s88_s26, %s3314_s17  ;;  %p3319_p8 = scmp.lt.s32.totalorder %s88_s26, %s88_s26 }
  0x50   :  { %p3320_p9 = scmp.lt.s32.totalorder %s3318_s8, %s3314_s17 }
  0x52   :  { %p3321_p10 = por %p3320_p9, %p3319_p8 }
  0x54   :  { %p3322_p11 = pnand %p3321_p10, %p3315_p7 }
  0x56   :  { %3325 = shalt.err (!%p3322_p11)
}
  0x57   :  { %90 = dma.hbm_to_vmem [thread:$0]  %s4015_s10, 16, %s88_s26, [#allocation10]  }
  0x58   :  { %3326 = dma.done.wait [#allocation5], 256  }
  0x59   :  { %3327 = vsyncadd [#allocation5], 4294967040 }
  0x5a   :  { %3328 = dma.done.wait [#allocation7], 272  }
  0x5b   :  { %3329 = vsyncadd [#allocation7], 4294967024 }
  0x5c   :  { %3330 = dma.done.wait [#allocation10], 272  }
  0x5d   :  { %3331 = vsyncadd [#allocation10], 4294967024  ;;  %v3339_v1 = vmov 0.0   ;;  %vm3340_vm0 = vmmov 0   ;;  %vm118_vm1 = vcmask 1043456   ;;  %v3501_v2 = vld [vmem:[%s4007_s2] sm:$0xff]  }
  0x5e   :  { %2757 = vmatprep.subr.bf16.mxu1 %v3339_v1  ;;  %2751 = vmatprep.subr.bf16.mxu0 %v3339_v1  ;;  %vm114_vm2 = vcmask 64512   ;;  %v113_v3 = vld [vmem:[%s4006_s1] sm:$0xf]  ;;  %v3513_v7 = vld [vmem:[%s4007_s2 + $0x8] sm:$0xff]   ;;  %v3341_v8 = vmov 0   ;;  %vm178_vm3 = vcmask 261120  }
  0x5f   :  { %2753 = vmatprep.mubr.msk.bf16.mxu0 %vm3340_vm0, %v3339_v1  ;;  %2761 = vmatprep.mubr.msk.bf16.mxu1 %vm3340_vm0, %v3339_v1  ;;  %v111_v4 = vld [vmem:[%s4005_s0] sm:$0xff]  ;;  %v120_v5 = vsel %vm118_vm1, %v113_v3, 0  ;;  %s3342_s0 = smov 32   ;;  %vm251_vm4 = vcmask 253952   ;;  %vm421_vm5 = vcmask 256002   ;;  %vm593_vm6 = vcmask 258052  }
  0x60   :  { %2758 = vmatpush3.bf16.msra.mxu1 %v3501_v2  ;;  %v112_v6 = vpack.c.bf16 %v111_v4, %v111_v4  ;;  %2752 = vmatpush3.bf16.msra.mxu0 %v120_v5  ;;  %vm765_vm7 = vcmask 260102   ;;  %vm335_vm8 = vcmask 254977   ;;  %vm506_vm9 = vcmask 257027  }
  0x61   :  { %2759 = vmatprep.subr.bf16.mxu1 %v3339_v1  ;;  %2765 = vmatprep.subr.bf16.mxu0 %v3339_v1  ;;  %vm678_vm10 = vcmask 259077   ;;  %vm850_vm11 = vcmask 261127   ;;  %vm2579_vm12 = vcmask 7168  }
  0x63   :  { %2754 = vmatmul.mubr.msk.bf16.vlgmr.msra.gmra.mrb[0].mxu0 %vm114_vm2, %v112_v6 }
  0x64   :  { %2760 = vmatpush3.bf16.msra.mxu1 %v3513_v7  ;;  %2766 = vmatpush3.bf16.msra.mxu0 %v3501_v2 }
  0x65   :  { %2769 = vmatprep.mubr.msk.bf16.mxu0 %vm3340_vm0, %v3339_v1  ;;  %2767 = vmatprep.subr.bf16.mxu0 %v3339_v1 }
  0x66   :  { %2773 = vmatprep.subr.bf16.mxu1 %v3339_v1 }
  0x67   :  { %2762 = vmatmul.mubr.bf16.vlgmr.msra.gmra.mrb[0].mxu1 %v3341_v8 }
  0x68   :  { %2774 = vmatpush3.bf16.msra.mxu1 %v3501_v2  ;;  %2777 = vmatprep.mubr.msk.bf16.mxu1 %vm3340_vm0, %v3339_v1 }
  0x69   :  { %2768 = vmatpush3.bf16.msra.mxu0 %v3513_v7  ;;  %2775 = vmatprep.subr.bf16.mxu1 %v3339_v1 }
  0x6a   :  { %2781 = vmatprep.subr.bf16.mxu0 %v3339_v1 }
  0x6c   :  { %2776 = vmatpush3.bf16.msra.mxu1 %v3513_v7 }
  0x6d   :  { %2789 = vmatprep.subr.bf16.mxu1 %v3339_v1 }
 0x136   :  { %v3532_v9 = vpop.f32.mrb[0].mxu0 }
 0x137   :  { %v2755_v10 = vpop.f32.mrb[1].mxu0 }
 0x138   :  { %v159_v11 = vpop.f32.mrb[2].mxu0 }
 0x139   :  { %v2756_v12 = vpop.f32.mrb[3].mxu0 }
 0x13a   :  { %v216_v13 = vpop.f32.mrb[0].mxu1 }
 0x13b   :  { %v222_v14 = vadd.f32 %v216_v13, %v3532_v9  ;;  %v2763_v15 = vpop.f32.mrb[1].mxu1 }
 0x13c   :  { %v219_v16 = vpop.f32.mrb[2].mxu1 }
 0x13d   :  { %v2764_v17 = vpop.f32.mrb[3].mxu1  ;;  %3024 = vtanh.f32 %v222_v14  ;;  %v2591_v19 = vmul.f32 -1.442695, %v222_v14 }
 0x13f   :  { %3026 = vpow2.f32 %v2591_v19 }
 0x147   :  { %v3025_v18 = vpop.eup %3024 }
 0x148   :  { %232 = vrot.lane.b32.xlu0 %v3025_v18, %s3334_s21 }
 0x149   :  { %v3027_v20 = vpop.eup %3026 }
 0x14a   :  { %v226_v21 = vadd.f32 1.0, %v3027_v20 }
 0x14c   :  { %3028 = vrcp.f32 %v226_v21 }
 0x156   :  { %v3029_v22 = vpop.eup %3028 }
 0x157   :  { %v230_v25 = vmul.f32 0.0, %v3029_v22 }
 0x1ba   :  { %v233_v23 = vpop.permute.xlu0 %232 }
 0x1bb   :  { %v235_v24 = vmul.f32 %v3029_v22, %v233_v23 }
 0x1bd   :  { %237 = vrot.lane.b32.xlu0 %v235_v24, %s3342_s0 }
 0x22f   :  { %v238_v26 = vpop.permute.xlu0 %237 }
 0x230   :  { %v240_v27 = vadd.f32 %v238_v26, %v230_v25 }
 0x232   :  { %3030 = vtanh.f32 %v240_v27  ;;  %v312_v46 = vrot.slane %v240_v27, 7 }
 0x23c   :  { %v3031_v28 = vpop.eup %3030 }
 0x23d   :  { %243 = vrot.lane.b32.xlu1 %v3031_v28, %s3334_s21 }
 0x2af   :  { %v244_v29 = vpop.permute.xlu1 %243 }
 0x2b0   :  { %v3538_v30 = vmul.f32 %v3029_v22, %v244_v29 }
 0x2b2   :  { %v253_v31 = vpack.c.bf16 %v3538_v30, %v3538_v30 }
 0x2b4   :  { %255 = vrot.lane.b32.xlu1 %v253_v31, %s3342_s0 }
 0x326   :  { %v256_v32 = vpop.permute.xlu1 %255 }
 0x327   :  { %2770 = vmatmul.mubr.msk.bf16.vlgmr.msra.gmra.mrb[4].mxu0 %vm178_vm3, %v256_v32 }
 0x328   :  { %2782 = vmatpush3.bf16.msra.mxu0 %v3501_v2  ;;  %2785 = vmatprep.mubr.msk.bf16.mxu0 %vm3340_vm0, %v3339_v1 }
 0x329   :  { %2783 = vmatprep.subr.bf16.mxu0 %v3339_v1 }
 0x32c   :  { %2784 = vmatpush3.bf16.msra.mxu0 %v3513_v7 }
 0x32d   :  { %2797 = vmatprep.subr.bf16.mxu0 %v3339_v1 }
 0x3fa   :  { %v294_v33 = vpop.f32.mrb[4].mxu0 }
 0x3fb   :  { %v301_v34 = vrot.slane %v294_v33, 7  ;;  %v2771_v35 = vpop.f32.mrb[5].mxu0 }
 0x3fc   :  { %v297_v36 = vpop.f32.mrb[6].mxu0 }
 0x3fd   :  { %v303_v37 = vadd.f32 %v301_v34, %v3532_v9  ;;  %v2772_v38 = vpop.f32.mrb[7].mxu0 }
 0x3ff   :  { %3032 = vtanh.f32 %v303_v37  ;;  %v2593_v40 = vmul.f32 -1.442695, %v303_v37 }
 0x401   :  { %3034 = vpow2.f32 %v2593_v40 }
 0x409   :  { %v3033_v39 = vpop.eup %3032 }
 0x40a   :  { %316 = vrot.lane.b32.xlu0 %v3033_v39, %s3334_s21 }
 0x40b   :  { %v3035_v41 = vpop.eup %3034 }
 0x40c   :  { %v307_v42 = vadd.f32 1.0, %v3035_v41 }
 0x40e   :  { %3036 = vrcp.f32 %v307_v42 }
 0x418   :  { %v3037_v43 = vpop.eup %3036 }
 0x419   :  { %v314_v47 = vmul.f32 %v3037_v43, %v312_v46 }
 0x47c   :  { %v317_v44 = vpop.permute.xlu0 %316 }
 0x47d   :  { %v319_v45 = vmul.f32 %v3037_v43, %v317_v44 }
 0x47f   :  { %321 = vrot.lane.b32.xlu1 %v319_v45, %s3342_s0 }
 0x4f1   :  { %v322_v48 = vpop.permute.xlu1 %321 }
 0x4f2   :  { %v324_v49 = vadd.f32 %v322_v48, %v314_v47 }
 0x4f4   :  { %3038 = vtanh.f32 %v324_v49  ;;  %v398_v10 = vrot.slane %v324_v49, 7 }
 0x4fe   :  { %v3039_v50 = vpop.eup %3038 }
 0x4ff   :  { %327 = vrot.lane.b32.xlu0 %v3039_v50, %s3334_s21 }
 0x571   :  { %v328_v51 = vpop.permute.xlu0 %327 }
 0x572   :  { %v3554_v52 = vmul.f32 %v3037_v43, %v328_v51 }
 0x574   :  { %v337_v53 = vpack.c.bf16 %v3554_v52, %v3554_v52 }
 0x576   :  { %v339_v54 = vshrl.u32 %v337_v53, 16 }
 0x578   :  { %341 = vrot.lane.b32.xlu1 %v339_v54, %s3342_s0 }
 0x5ea   :  { %v342_v55 = vpop.permute.xlu1 %341 }
 0x5eb   :  { %2778 = vmatmul.mubr.msk.bf16.vlgmr.msra.gmra.mrb[4].mxu1 %vm178_vm3, %v342_v55 }
 0x5ec   :  { %2790 = vmatpush3.bf16.msra.mxu1 %v3501_v2  ;;  %2793 = vmatprep.mubr.msk.bf16.mxu1 %vm3340_vm0, %v3339_v1 }
 0x5ed   :  { %2791 = vmatprep.subr.bf16.mxu1 %v3339_v1 }
 0x5f0   :  { %2792 = vmatpush3.bf16.msra.mxu1 %v3513_v7 }
 0x5f1   :  { %2805 = vmatprep.subr.bf16.mxu1 %v3339_v1 }
 0x6be   :  { %v380_v56 = vpop.f32.mrb[4].mxu1 }
 0x6bf   :  { %v387_v57 = vrot.slane %v380_v56, 6  ;;  %v2779_v58 = vpop.f32.mrb[5].mxu1 }
 0x6c0   :  { %v383_v59 = vpop.f32.mrb[6].mxu1 }
 0x6c1   :  { %v389_v60 = vadd.f32 %v387_v57, %v3532_v9  ;;  %v2780_v61 = vpop.f32.mrb[7].mxu1 }
 0x6c3   :  { %3040 = vtanh.f32 %v389_v60  ;;  %v2595_v63 = vmul.f32 -1.442695, %v389_v60 }
 0x6c5   :  { %3042 = vpow2.f32 %v2595_v63 }
 0x6cd   :  { %v3041_v62 = vpop.eup %3040 }
 0x6ce   :  { %402 = vrot.lane.b32.xlu0 %v3041_v62, %s3334_s21 }
 0x6cf   :  { %v3043_v0 = vpop.eup %3042 }
 0x6d0   :  { %v393_v3 = vadd.f32 1.0, %v3043_v0 }
 0x6d2   :  { %3044 = vrcp.f32 %v393_v3 }
 0x6dc   :  { %v3045_v4 = vpop.eup %3044 }
 0x6dd   :  { %v400_v11 = vmul.f32 %v3045_v4, %v398_v10 }
 0x740   :  { %v403_v5 = vpop.permute.xlu0 %402 }
 0x741   :  { %v405_v6 = vmul.f32 %v3045_v4, %v403_v5 }
 0x743   :  { %407 = vrot.lane.b32.xlu1 %v405_v6, %s3342_s0 }
 0x7b5   :  { %v408_v12 = vpop.permute.xlu1 %407 }
 0x7b6   :  { %v410_v13 = vadd.f32 %v408_v12, %v400_v11 }
 0x7b8   :  { %3046 = vtanh.f32 %v410_v13  ;;  %v483_v34 = vrot.slane %v410_v13, 7 }
 0x7c2   :  { %v3047_v14 = vpop.eup %3046 }
 0x7c3   :  { %413 = vrot.lane.b32.xlu0 %v3047_v14, %s3334_s21 }
 0x835   :  { %v414_v15 = vpop.permute.xlu0 %413 }
 0x836   :  { %v3570_v16 = vmul.f32 %v3045_v4, %v414_v15 }
 0x838   :  { %v423_v17 = vpack.c.bf16 %v3570_v16, %v3570_v16 }
 0x83a   :  { %v425_v18 = vrot.slane %v423_v17, 1 }
 0x83c   :  { %426 = vrot.lane.b32.xlu1 %v425_v18, %s3342_s0 }
 0x8ae   :  { %v427_v19 = vpop.permute.xlu1 %426 }
 0x8af   :  { %2786 = vmatmul.mubr.msk.bf16.vlgmr.msra.gmra.mrb[8].mxu0 %vm178_vm3, %v427_v19 }
 0x8b0   :  { %2798 = vmatpush3.bf16.msra.mxu0 %v3501_v2  ;;  %2801 = vmatprep.mubr.msk.bf16.mxu0 %vm3340_vm0, %v3339_v1 }
 0x8b1   :  { %2799 = vmatprep.subr.bf16.mxu0 %v3339_v1 }
 0x8b4   :  { %2800 = vmatpush3.bf16.msra.mxu0 %v3513_v7 }
 0x8b5   :  { %2813 = vmatprep.subr.bf16.mxu0 %v3339_v1 }
 0x982   :  { %v465_v20 = vpop.f32.mrb[8].mxu0 }
 0x983   :  { %v472_v21 = vrot.slane %v465_v20, 5  ;;  %v2787_v22 = vpop.f32.mrb[9].mxu0 }
 0x984   :  { %v468_v23 = vpop.f32.mrb[10].mxu0 }
 0x985   :  { %v474_v24 = vadd.f32 %v472_v21, %v3532_v9  ;;  %v2788_v25 = vpop.f32.mrb[11].mxu0 }
 0x987   :  { %3048 = vtanh.f32 %v474_v24  ;;  %v2597_v27 = vmul.f32 -1.442695, %v474_v24 }
 0x989   :  { %3050 = vpow2.f32 %v2597_v27 }
 0x991   :  { %v3049_v26 = vpop.eup %3048 }
 0x992   :  { %487 = vrot.lane.b32.xlu0 %v3049_v26, %s3334_s21 }
 0x993   :  { %v3051_v28 = vpop.eup %3050 }
 0x994   :  { %v478_v29 = vadd.f32 1.0, %v3051_v28 }
 0x996   :  { %3052 = vrcp.f32 %v478_v29 }
 0x9a0   :  { %v3053_v31 = vpop.eup %3052 }
 0x9a1   :  { %v485_v35 = vmul.f32 %v3053_v31, %v483_v34 }
 0xa04   :  { %v488_v32 = vpop.permute.xlu0 %487 }
 0xa05   :  { %v490_v33 = vmul.f32 %v3053_v31, %v488_v32 }
 0xa07   :  { %492 = vrot.lane.b32.xlu1 %v490_v33, %s3342_s0 }
 0xa79   :  { %v493_v36 = vpop.permute.xlu1 %492 }
 0xa7a   :  { %v495_v37 = vadd.f32 %v493_v36, %v485_v35 }
 0xa7c   :  { %3054 = vtanh.f32 %v495_v37  ;;  %v570_v59 = vrot.slane %v495_v37, 7 }
 0xa86   :  { %v3055_v38 = vpop.eup %3054 }
 0xa87   :  { %498 = vrot.lane.b32.xlu0 %v3055_v38, %s3334_s21 }
 0xaf9   :  { %v499_v39 = vpop.permute.xlu0 %498 }
 0xafa   :  { %v3586_v40 = vmul.f32 %v3053_v31, %v499_v39 }
 0xafc   :  { %v508_v41 = vpack.c.bf16 %v3586_v40, %v3586_v40 }
 0xafe   :  { %v510_v42 = vshrl.u32 %v508_v41, 16 }
 0xb00   :  { %v512_v43 = vrot.slane %v510_v42, 1 }
 0xb02   :  { %513 = vrot.lane.b32.xlu1 %v512_v43, %s3342_s0 }
 0xb74   :  { %v514_v44 = vpop.permute.xlu1 %513 }
 0xb75   :  { %2794 = vmatmul.mubr.msk.bf16.vlgmr.msra.gmra.mrb[8].mxu1 %vm178_vm3, %v514_v44 }
 0xb76   :  { %2806 = vmatpush3.bf16.msra.mxu1 %v3501_v2  ;;  %2809 = vmatprep.mubr.msk.bf16.mxu1 %vm3340_vm0, %v3339_v1 }
 0xb77   :  { %2807 = vmatprep.subr.bf16.mxu1 %v3339_v1 }
 0xb7a   :  { %2808 = vmatpush3.bf16.msra.mxu1 %v3513_v7 }
 0xb7b   :  { %2821 = vmatprep.subr.bf16.mxu1 %v3339_v1 }
 0xc48   :  { %v552_v45 = vpop.f32.mrb[8].mxu1 }
 0xc49   :  { %v559_v46 = vrot.slane %v552_v45, 4  ;;  %v2795_v47 = vpop.f32.mrb[9].mxu1 }
 0xc4a   :  { %v555_v48 = vpop.f32.mrb[10].mxu1 }
 0xc4b   :  { %v561_v49 = vadd.f32 %v559_v46, %v3532_v9  ;;  %v2796_v50 = vpop.f32.mrb[11].mxu1 }
 0xc4d   :  { %3056 = vtanh.f32 %v561_v49  ;;  %v2599_v53 = vmul.f32 -1.442695, %v561_v49 }
 0xc4f   :  { %3058 = vpow2.f32 %v2599_v53 }
 0xc57   :  { %v3057_v51 = vpop.eup %3056 }
 0xc58   :  { %574 = vrot.lane.b32.xlu0 %v3057_v51, %s3334_s21 }
 0xc59   :  { %v3059_v54 = vpop.eup %3058 }
 0xc5a   :  { %v565_v55 = vadd.f32 1.0, %v3059_v54 }
 0xc5c   :  { %3060 = vrcp.f32 %v565_v55 }
 0xc66   :  { %v3061_v56 = vpop.eup %3060 }
 0xc67   :  { %v572_v60 = vmul.f32 %v3061_v56, %v570_v59 }
 0xcca   :  { %v575_v57 = vpop.permute.xlu0 %574 }
 0xccb   :  { %v577_v58 = vmul.f32 %v3061_v56, %v575_v57 }
 0xccd   :  { %579 = vrot.lane.b32.xlu1 %v577_v58, %s3342_s0 }
 0xd3f   :  { %v580_v61 = vpop.permute.xlu1 %579 }
 0xd40   :  { %v582_v62 = vadd.f32 %v580_v61, %v572_v60 }
 0xd42   :  { %3062 = vtanh.f32 %v582_v62  ;;  %v655_v22 = vrot.slane %v582_v62, 7 }
 0xd4c   :  { %v3063_v63 = vpop.eup %3062 }
 0xd4d   :  { %585 = vrot.lane.b32.xlu0 %v3063_v63, %s3334_s21 }
 0xdbf   :  { %v586_v0 = vpop.permute.xlu0 %585 }
 0xdc0   :  { %v3602_v3 = vmul.f32 %v3061_v56, %v586_v0 }
 0xdc2   :  { %v595_v4 = vpack.c.bf16 %v3602_v3, %v3602_v3 }
 0xdc4   :  { %v597_v5 = vrot.slane %v595_v4, 2 }
 0xdc6   :  { %598 = vrot.lane.b32.xlu1 %v597_v5, %s3342_s0 }
 0xe38   :  { %v599_v6 = vpop.permute.xlu1 %598 }
 0xe39   :  { %2802 = vmatmul.mubr.msk.bf16.vlgmr.msra.gmra.mrb[12].mxu0 %vm178_vm3, %v599_v6 }
 0xe3a   :  { %2814 = vmatpush3.bf16.msra.mxu0 %v3501_v2  ;;  %2817 = vmatprep.mubr.msk.bf16.mxu0 %vm3340_vm0, %v3339_v1 }
 0xe3b   :  { %2815 = vmatprep.subr.bf16.mxu0 %v3339_v1 }
 0xe3e   :  { %2816 = vmatpush3.bf16.msra.mxu0 %v3513_v7 }
 0xe3f   :  { %2829 = vmatprep.subr.bf16.mxu0 %v3339_v1 }
 0xf0c   :  { %v637_v10 = vpop.f32.mrb[12].mxu0 }
 0xf0d   :  { %v644_v11 = vrot.slane %v637_v10, 3  ;;  %v2803_v12 = vpop.f32.mrb[13].mxu0 }
 0xf0e   :  { %v640_v13 = vpop.f32.mrb[14].mxu0 }
 0xf0f   :  { %v646_v14 = vadd.f32 %v644_v11, %v3532_v9  ;;  %v2804_v15 = vpop.f32.mrb[15].mxu0 }
 0xf11   :  { %3064 = vtanh.f32 %v646_v14  ;;  %v2601_v2 = vmul.f32 -1.442695, %v646_v14 }
 0xf13   :  { %3066 = vpow2.f32 %v2601_v2 }
 0xf1b   :  { %v3065_v17 = vpop.eup %3064 }
 0xf1c   :  { %659 = vrot.lane.b32.xlu0 %v3065_v17, %s3334_s21 }
 0xf1d   :  { %v3067_v18 = vpop.eup %3066 }
 0xf1e   :  { %v650_v19 = vadd.f32 1.0, %v3067_v18 }
 0xf20   :  { %3068 = vrcp.f32 %v650_v19  ;;  %v3658_v19 = vld [vmem:[%s4009_s4] sm:$0xff]  }
 0xf2a   :  { %v3069_v20 = vpop.eup %3068 }
 0xf2b   :  { %v657_v23 = vmul.f32 %v3069_v20, %v655_v22 }
 0xf8e   :  { %v660_v7 = vpop.permute.xlu0 %659 }
 0xf8f   :  { %v662_v21 = vmul.f32 %v3069_v20, %v660_v7 }
 0xf91   :  { %664 = vrot.lane.b32.xlu1 %v662_v21, %s3342_s0 }
0x1003   :  { %v665_v24 = vpop.permute.xlu1 %664 }
0x1004   :  { %v667_v25 = vadd.f32 %v665_v24, %v657_v23 }
0x1006   :  { %3070 = vtanh.f32 %v667_v25  ;;  %v742_v48 = vrot.slane %v667_v25, 7 }
0x1010   :  { %v3071_v26 = vpop.eup %3070 }
0x1011   :  { %670 = vrot.lane.b32.xlu0 %v3071_v26, %s3334_s21 }
0x1083   :  { %v671_v27 = vpop.permute.xlu0 %670 }
0x1084   :  { %v3618_v28 = vmul.f32 %v3069_v20, %v671_v27  ;;  %v3011_v20 = vld [vmem:[%s4008_s3] sm:$0xff]  }
0x1086   :  { %v680_v29 = vpack.c.bf16 %v3618_v28, %v3618_v28 }
0x1088   :  { %v682_v31 = vshrl.u32 %v680_v29, 16 }
0x108a   :  { %v684_v32 = vrot.slane %v682_v31, 2 }
0x108c   :  { %685 = vrot.lane.b32.xlu1 %v684_v32, %s3342_s0 }
0x10fe   :  { %v686_v33 = vpop.permute.xlu1 %685 }
0x10ff   :  { %2810 = vmatmul.mubr.msk.bf16.vlgmr.msra.gmra.mrb[12].mxu1 %vm178_vm3, %v686_v33 }
0x1100   :  { %2825 = vmatprep.mubr.msk.bf16.mxu1 %vm3340_vm0, %v3339_v1  ;;  %2822 = vmatpush3.bf16.msra.mxu1 %v3011_v20 }
0x1101   :  { %2823 = vmatprep.subr.bf16.mxu1 %v3339_v1 }
0x11d2   :  { %v724_v34 = vpop.f32.mrb[12].mxu1 }
0x11d3   :  { %v731_v35 = vrot.slane %v724_v34, 2  ;;  %v2811_v36 = vpop.f32.mrb[13].mxu1 }
0x11d4   :  { %v727_v37 = vpop.f32.mrb[14].mxu1 }
0x11d5   :  { %v733_v38 = vadd.f32 %v731_v35, %v3532_v9  ;;  %v2812_v39 = vpop.f32.mrb[15].mxu1 }
0x11d7   :  { %3072 = vtanh.f32 %v733_v38  ;;  %v2603_v42 = vmul.f32 -1.442695, %v733_v38 }
0x11d9   :  { %3074 = vpow2.f32 %v2603_v42 }
0x11e1   :  { %v3073_v41 = vpop.eup %3072 }
0x11e2   :  { %746 = vrot.lane.b32.xlu0 %v3073_v41, %s3334_s21 }
0x11e3   :  { %v3075_v43 = vpop.eup %3074 }
0x11e4   :  { %v737_v44 = vadd.f32 1.0, %v3075_v43 }
0x11e6   :  { %3076 = vrcp.f32 %v737_v44 }
0x11f0   :  { %v3077_v45 = vpop.eup %3076 }
0x11f1   :  { %v744_v49 = vmul.f32 %v3077_v45, %v742_v48 }
0x1254   :  { %v747_v46 = vpop.permute.xlu0 %746 }
0x1255   :  { %v749_v47 = vmul.f32 %v3077_v45, %v747_v46 }
0x1257   :  { %751 = vrot.lane.b32.xlu1 %v749_v47, %s3342_s0 }
0x12c9   :  { %v752_v50 = vpop.permute.xlu1 %751 }
0x12ca   :  { %v754_v51 = vadd.f32 %v752_v50, %v744_v49 }
0x12cc   :  { %3078 = vtanh.f32 %v754_v51 }
0x12d6   :  { %v3079_v53 = vpop.eup %3078 }
0x12d7   :  { %757 = vrot.lane.b32.xlu0 %v3079_v53, %s3334_s21 }
0x1349   :  { %v758_v54 = vpop.permute.xlu0 %757 }
0x134a   :  { %v760_v55 = vmul.f32 %v3077_v45, %v758_v54 }
0x134c   :  { %v767_v56 = vpack.c.bf16 %v760_v55, %v760_v55 }
0x134e   :  { %v769_v57 = vrot.slane %v767_v56, 3 }
0x1350   :  { %770 = vrot.lane.b32.xlu1 %v769_v57, %s3342_s0 }
0x13c2   :  { %v771_v58 = vpop.permute.xlu1 %770 }
0x13c3   :  { %2818 = vmatmul.mubr.msk.bf16.vlgmr.msra.gmra.mrb[16].mxu0 %vm178_vm3, %v771_v58 }
0x13c4   :  { %2833 = vmatprep.mubr.msk.bf16.mxu0 %vm3340_vm0, %v3339_v1  ;;  %2830 = vmatpush3.bf16.msra.mxu0 %v3658_v19 }
0x13c5   :  { %2831 = vmatprep.subr.bf16.mxu0 %v3339_v1 }
0x1496   :  { %v809_v59 = vpop.f32.mrb[16].mxu0 }
0x1497   :  { %v816_v60 = vrot.slane %v809_v59, 1  ;;  %v2819_v61 = vpop.f32.mrb[17].mxu0 }
0x1498   :  { %v812_v62 = vpop.f32.mrb[18].mxu0 }
0x1499   :  { %v818_v63 = vadd.f32 %v816_v60, %v3532_v9  ;;  %v2820_v0 = vpop.f32.mrb[19].mxu0  ;;  %v827_v9 = vrot.slane %v754_v51, 7 }
0x149b   :  { %3080 = vtanh.f32 %v818_v63  ;;  %v2605_v5 = vmul.f32 -1.442695, %v818_v63 }
0x149d   :  { %3082 = vpow2.f32 %v2605_v5 }
0x14a5   :  { %v3081_v4 = vpop.eup %3080 }
0x14a6   :  { %831 = vrot.lane.b32.xlu0 %v3081_v4, %s3334_s21 }
0x14a7   :  { %v3083_v6 = vpop.eup %3082 }
0x14a8   :  { %v822_v10 = vadd.f32 1.0, %v3083_v6 }
0x14aa   :  { %3084 = vrcp.f32 %v822_v10 }
0x14b4   :  { %v3085_v11 = vpop.eup %3084 }
0x14b5   :  { %v829_v14 = vmul.f32 %v3085_v11, %v827_v9 }
0x1518   :  { %v832_v12 = vpop.permute.xlu0 %831 }
0x1519   :  { %v834_v13 = vmul.f32 %v3085_v11, %v832_v12 }
0x151b   :  { %836 = vrot.lane.b32.xlu1 %v834_v13, %s3342_s0 }
0x151f   :  { %248 = vrot.lane.b32.xlu1 %v3538_v30, %s3342_s0 }
0x1523   :  { %418 = vrot.lane.b32.xlu1 %v3570_v16, %s3342_s0 }
0x1527   :  { %590 = vrot.lane.b32.xlu1 %v3602_v3, %s3342_s0 }
0x152b   :  { %762 = vrot.lane.b32.xlu1 %v760_v55, %s3342_s0 }
0x158d   :  { %v837_v15 = vpop.permute.xlu1 %836 }
0x158e   :  { %v839_v17 = vadd.f32 %v837_v15, %v829_v14 }
0x1590   :  { %3086 = vtanh.f32 %v839_v17 }
0x1591   :  { %v249_v2 = vpop.permute.xlu1 %248 }
0x1592   :  { %252 = vst.msk [vmem:[#allocation2] sm:$0x1] %vm251_vm4, %v249_v2 }
0x1595   :  { %v419_v18 = vpop.permute.xlu1 %418 }
0x1596   :  { %422 = vst.msk [vmem:[#allocation2] sm:$0x4] %vm421_vm5, %v419_v18 }
0x1599   :  { %v591_v30 = vpop.permute.xlu1 %590 }
0x159a   :  { %v3087_v16 = vpop.eup %3086  ;;  %594 = vst.msk [vmem:[#allocation2] sm:$0x10] %vm593_vm6, %v591_v30 }
0x159b   :  { %842 = vrot.lane.b32.xlu0 %v3087_v16, %s3334_s21 }
0x159d   :  { %v763_v3 = vpop.permute.xlu1 %762 }
0x159e   :  { %766 = vst.msk [vmem:[#allocation2] sm:$0x40] %vm765_vm7, %v763_v3 }
0x159f   :  { %332 = vrot.lane.b32.xlu0 %v3554_v52, %s3342_s0  ;;  %v3668_v52 = vld [vmem:[%s4009_s4 + $0x8] sm:$0xff]  }
0x15a0   :  { %2832 = vmatpush3.bf16.msra.mxu0 %v3668_v52 }
0x15a1   :  { %2845 = vmatprep.subr.bf16.mxu0 %v3339_v1 }
0x15a3   :  { %503 = vrot.lane.b32.xlu0 %v3586_v40, %s3342_s0  ;;  %v3013_v40 = vld [vmem:[%s4008_s3 + $0x8] sm:$0xff]   ;;  %2834 = vmatmul.mubr.bf16.vlgmr.msra.gmra.mrb[20].mxu0 %v3341_v8 }
0x15a4   :  { %2824 = vmatpush3.bf16.msra.mxu1 %v3013_v40  ;;  %2846 = vmatpush3.bf16.msra.mxu0 %v3658_v19 }
0x15a5   :  { %2837 = vmatprep.subr.bf16.mxu1 %v3339_v1  ;;  %2847 = vmatprep.subr.bf16.mxu0 %v3339_v1 }
0x15a6   :  { %2849 = vmatprep.mubr.msk.bf16.mxu0 %vm3340_vm0, %v3339_v1 }
0x15a7   :  { %675 = vrot.lane.b32.xlu0 %v3618_v28, %s3342_s0 }
0x15a8   :  { %2848 = vmatpush3.bf16.msra.mxu0 %v3668_v52 }
0x15a9   :  { %2861 = vmatprep.subr.bf16.mxu0 %v3339_v1 }
0x160d   :  { %v843_v7 = vpop.permute.xlu0 %842 }
0x160e   :  { %v845_v21 = vmul.f32 %v3085_v11, %v843_v7 }
0x1610   :  { %847 = vrot.lane.b32.xlu0 %v845_v21, %s3342_s0 }
0x1611   :  { %v333_v22 = vpop.permute.xlu0 %332 }
0x1612   :  { %336 = vst.msk [vmem:[#allocation2] sm:$0x2] %vm335_vm8, %v333_v22 }
0x1615   :  { %v504_v23 = vpop.permute.xlu0 %503 }
0x1616   :  { %507 = vst.msk [vmem:[#allocation2] sm:$0x8] %vm506_vm9, %v504_v23 }
0x1619   :  { %v676_v24 = vpop.permute.xlu0 %675 }
0x161a   :  { %679 = vst.msk [vmem:[#allocation2] sm:$0x20] %vm678_vm10, %v676_v24 }
0x1676   :  { %v963_v28 = vpop.f32.mrb[20].mxu0 }
0x1677   :  { %v2835_v29 = vpop.f32.mrb[21].mxu0 }
0x1678   :  { %v966_v31 = vpop.f32.mrb[22].mxu0 }
0x1679   :  { %v2836_v32 = vpop.f32.mrb[23].mxu0 }
0x1682   :  { %v848_v25 = vpop.permute.xlu0 %847 }
0x1683   :  { %851 = vst.msk [vmem:[#allocation2] sm:$0x80] %vm850_vm11, %v848_v25 }
0x168a   :  { %v852_v26 = vld [vmem:[#allocation2] sm:$0xff] }
0x168b   :  { %v853_v27 = vpack.c.bf16 %v852_v26, %v852_v26 }
0x168d   :  { %2826 = vmatmul.mubr.msk.bf16.vlgmr.msra.gmra.mrb[16].mxu1 %vm178_vm3, %v853_v27 }
0x168e   :  { %2838 = vmatpush3.bf16.msra.mxu1 %v3658_v19  ;;  %2841 = vmatprep.mubr.msk.bf16.mxu1 %vm3340_vm0, %v3339_v1 }
0x168f   :  { %2839 = vmatprep.subr.bf16.mxu1 %v3339_v1 }
0x1692   :  { %2840 = vmatpush3.bf16.msra.mxu1 %v3668_v52 }
0x1693   :  { %2853 = vmatprep.subr.bf16.mxu1 %v3339_v1 }
0x1760   :  { %v3696_v33 = vpop.f32.mrb[16].mxu1 }
0x1761   :  { %v2827_v34 = vpop.f32.mrb[17].mxu1  ;;  %v969_v35 = vadd.f32 %v963_v28, %v3696_v33 }
0x1762   :  { %v910_v36 = vpop.f32.mrb[18].mxu1 }
0x1763   :  { %v2828_v37 = vpop.f32.mrb[19].mxu1  ;;  %3088 = vtanh.f32 %v969_v35  ;;  %v2611_v39 = vmul.f32 -1.442695, %v969_v35 }
0x1765   :  { %3090 = vpow2.f32 %v2611_v39 }
0x176d   :  { %v3089_v38 = vpop.eup %3088 }
0x176e   :  { %979 = vrot.lane.b32.xlu1 %v3089_v38, %s3334_s21 }
0x176f   :  { %v3091_v41 = vpop.eup %3090 }
0x1770   :  { %v973_v42 = vadd.f32 1.0, %v3091_v41 }
0x1772   :  { %3092 = vrcp.f32 %v973_v42 }
0x177c   :  { %v3093_v43 = vpop.eup %3092 }
0x177d   :  { %v977_v46 = vmul.f32 0.0, %v3093_v43 }
0x17e0   :  { %v980_v44 = vpop.permute.xlu1 %979 }
0x17e1   :  { %v982_v45 = vmul.f32 %v3093_v43, %v980_v44 }
0x17e3   :  { %984 = vrot.lane.b32.xlu0 %v982_v45, %s3342_s0 }
0x1855   :  { %v985_v47 = vpop.permute.xlu0 %984 }
0x1856   :  { %v987_v48 = vadd.f32 %v985_v47, %v977_v46 }
0x1858   :  { %3094 = vtanh.f32 %v987_v48  ;;  %v1058_v10 = vrot.slane %v987_v48, 7 }
0x1862   :  { %v3095_v49 = vpop.eup %3094 }
0x1863   :  { %990 = vrot.lane.b32.xlu1 %v3095_v49, %s3334_s21 }
0x18d5   :  { %v991_v50 = vpop.permute.xlu1 %990 }
0x18d6   :  { %v3702_v51 = vmul.f32 %v3093_v43, %v991_v50 }
0x18d8   :  { %v999_v53 = vpack.c.bf16 %v3702_v51, %v3702_v51 }
0x18da   :  { %1001 = vrot.lane.b32.xlu0 %v999_v53, %s3342_s0 }
0x194c   :  { %v1002_v54 = vpop.permute.xlu0 %1001 }
0x194d   :  { %2842 = vmatmul.mubr.msk.bf16.vlgmr.msra.gmra.mrb[20].mxu1 %vm178_vm3, %v1002_v54 }
0x194e   :  { %2854 = vmatpush3.bf16.msra.mxu1 %v3658_v19  ;;  %2857 = vmatprep.mubr.msk.bf16.mxu1 %vm3340_vm0, %v3339_v1 }
0x194f   :  { %2855 = vmatprep.subr.bf16.mxu1 %v3339_v1 }
0x1952   :  { %2856 = vmatpush3.bf16.msra.mxu1 %v3668_v52 }
0x1953   :  { %2869 = vmatprep.subr.bf16.mxu1 %v3339_v1 }
0x1a20   :  { %v1040_v55 = vpop.f32.mrb[20].mxu1 }
0x1a21   :  { %v1047_v56 = vrot.slane %v1040_v55, 7  ;;  %v2843_v57 = vpop.f32.mrb[21].mxu1 }
0x1a22   :  { %v1043_v58 = vpop.f32.mrb[22].mxu1 }
0x1a23   :  { %v1049_v59 = vadd.f32 %v1047_v56, %v3696_v33  ;;  %v2844_v60 = vpop.f32.mrb[23].mxu1 }
0x1a25   :  { %3096 = vtanh.f32 %v1049_v59  ;;  %v2613_v62 = vmul.f32 -1.442695, %v1049_v59 }
0x1a27   :  { %3098 = vpow2.f32 %v2613_v62 }
0x1a2f   :  { %v3097_v61 = vpop.eup %3096 }
0x1a30   :  { %1062 = vrot.lane.b32.xlu1 %v3097_v61, %s3334_s21 }
0x1a31   :  { %v3099_v63 = vpop.eup %3098 }
0x1a32   :  { %v1053_v0 = vadd.f32 1.0, %v3099_v63 }
0x1a34   :  { %3100 = vrcp.f32 %v1053_v0 }
0x1a3e   :  { %v3101_v4 = vpop.eup %3100 }
0x1a3f   :  { %v1060_v11 = vmul.f32 %v3101_v4, %v1058_v10 }
0x1aa2   :  { %v1063_v5 = vpop.permute.xlu1 %1062 }
0x1aa3   :  { %v1065_v6 = vmul.f32 %v3101_v4, %v1063_v5 }
0x1aa5   :  { %1067 = vrot.lane.b32.xlu0 %v1065_v6, %s3342_s0 }
0x1b17   :  { %v1068_v12 = vpop.permute.xlu0 %1067 }
0x1b18   :  { %v1070_v13 = vadd.f32 %v1068_v12, %v1060_v11 }
0x1b1a   :  { %3102 = vtanh.f32 %v1070_v13  ;;  %v1143_v28 = vrot.slane %v1070_v13, 7 }
0x1b24   :  { %v3103_v9 = vpop.eup %3102 }
0x1b25   :  { %1073 = vrot.lane.b32.xlu1 %v3103_v9, %s3334_s21 }
0x1b97   :  { %v1074_v14 = vpop.permute.xlu1 %1073 }
0x1b98   :  { %v3718_v15 = vmul.f32 %v3101_v4, %v1074_v14 }
0x1b9a   :  { %v1082_v17 = vpack.c.bf16 %v3718_v15, %v3718_v15 }
0x1b9c   :  { %v1084_v2 = vshrl.u32 %v1082_v17, 16 }
0x1b9e   :  { %1086 = vrot.lane.b32.xlu0 %v1084_v2, %s3342_s0 }
0x1c10   :  { %v1087_v18 = vpop.permute.xlu0 %1086 }
0x1c11   :  { %2850 = vmatmul.mubr.msk.bf16.vlgmr.msra.gmra.mrb[24].mxu0 %vm178_vm3, %v1087_v18 }
0x1c12   :  { %2862 = vmatpush3.bf16.msra.mxu0 %v3658_v19  ;;  %2865 = vmatprep.mubr.msk.bf16.mxu0 %vm3340_vm0, %v3339_v1 }
0x1c13   :  { %2863 = vmatprep.subr.bf16.mxu0 %v3339_v1 }
0x1c16   :  { %2864 = vmatpush3.bf16.msra.mxu0 %v3668_v52 }
0x1c17   :  { %2877 = vmatprep.subr.bf16.mxu0 %v3339_v1 }
0x1ce4   :  { %v1125_v30 = vpop.f32.mrb[24].mxu0 }
0x1ce5   :  { %v1132_v16 = vrot.slane %v1125_v30, 6  ;;  %v2851_v3 = vpop.f32.mrb[25].mxu0 }
0x1ce6   :  { %v1128_v20 = vpop.f32.mrb[26].mxu0 }
0x1ce7   :  { %v1134_v40 = vadd.f32 %v1132_v16, %v3696_v33  ;;  %v2852_v7 = vpop.f32.mrb[27].mxu0 }
0x1ce9   :  { %3104 = vtanh.f32 %v1134_v40  ;;  %v2615_v22 = vmul.f32 -1.442695, %v1134_v40 }
0x1ceb   :  { %3106 = vpow2.f32 %v2615_v22 }
0x1cf3   :  { %v3105_v21 = vpop.eup %3104 }
0x1cf4   :  { %1147 = vrot.lane.b32.xlu1 %v3105_v21, %s3334_s21 }
0x1cf5   :  { %v3107_v23 = vpop.eup %3106 }
0x1cf6   :  { %v1138_v24 = vadd.f32 1.0, %v3107_v23 }
0x1cf8   :  { %3108 = vrcp.f32 %v1138_v24 }
0x1d02   :  { %v3109_v25 = vpop.eup %3108 }
0x1d03   :  { %v1145_v29 = vmul.f32 %v3109_v25, %v1143_v28 }
0x1d66   :  { %v1148_v26 = vpop.permute.xlu1 %1147 }
0x1d67   :  { %v1150_v27 = vmul.f32 %v3109_v25, %v1148_v26 }
0x1d69   :  { %1152 = vrot.lane.b32.xlu0 %v1150_v27, %s3342_s0 }
0x1ddb   :  { %v1153_v31 = vpop.permute.xlu0 %1152 }
0x1ddc   :  { %v1155_v32 = vadd.f32 %v1153_v31, %v1145_v29 }
0x1dde   :  { %3110 = vtanh.f32 %v1155_v32  ;;  %v1227_v56 = vrot.slane %v1155_v32, 7 }
0x1de8   :  { %v3111_v34 = vpop.eup %3110 }
0x1de9   :  { %1158 = vrot.lane.b32.xlu1 %v3111_v34, %s3334_s21 }
0x1e5b   :  { %v1159_v35 = vpop.permute.xlu1 %1158 }
0x1e5c   :  { %v3734_v36 = vmul.f32 %v3109_v25, %v1159_v35 }
0x1e5e   :  { %v1167_v37 = vpack.c.bf16 %v3734_v36, %v3734_v36 }
0x1e60   :  { %v1169_v38 = vrot.slane %v1167_v37, 1 }
0x1e62   :  { %1170 = vrot.lane.b32.xlu0 %v1169_v38, %s3342_s0 }
0x1ed4   :  { %v1171_v39 = vpop.permute.xlu0 %1170 }
0x1ed5   :  { %2858 = vmatmul.mubr.msk.bf16.vlgmr.msra.gmra.mrb[24].mxu1 %vm178_vm3, %v1171_v39 }
0x1ed6   :  { %2870 = vmatpush3.bf16.msra.mxu1 %v3658_v19  ;;  %2873 = vmatprep.mubr.msk.bf16.mxu1 %vm3340_vm0, %v3339_v1 }
0x1ed7   :  { %2871 = vmatprep.subr.bf16.mxu1 %v3339_v1 }
0x1eda   :  { %2872 = vmatpush3.bf16.msra.mxu1 %v3668_v52 }
0x1edb   :  { %2885 = vmatprep.subr.bf16.mxu1 %v3339_v1 }
0x1fa8   :  { %v1209_v41 = vpop.f32.mrb[24].mxu1 }
0x1fa9   :  { %v1216_v42 = vrot.slane %v1209_v41, 5  ;;  %v2859_v43 = vpop.f32.mrb[25].mxu1 }
0x1faa   :  { %v1212_v44 = vpop.f32.mrb[26].mxu1 }
0x1fab   :  { %v1218_v45 = vadd.f32 %v1216_v42, %v3696_v33  ;;  %v2860_v46 = vpop.f32.mrb[27].mxu1 }
0x1fad   :  { %3112 = vtanh.f32 %v1218_v45  ;;  %v2617_v48 = vmul.f32 -1.442695, %v1218_v45 }
0x1faf   :  { %3114 = vpow2.f32 %v2617_v48 }
0x1fb7   :  { %v3113_v47 = vpop.eup %3112 }
0x1fb8   :  { %1231 = vrot.lane.b32.xlu1 %v3113_v47, %s3334_s21 }
0x1fb9   :  { %v3115_v49 = vpop.eup %3114 }
0x1fba   :  { %v1222_v50 = vadd.f32 1.0, %v3115_v49 }
0x1fbc   :  { %3116 = vrcp.f32 %v1222_v50 }
0x1fc6   :  { %v3117_v53 = vpop.eup %3116 }
0x1fc7   :  { %v1229_v57 = vmul.f32 %v3117_v53, %v1227_v56 }
0x202a   :  { %v1232_v54 = vpop.permute.xlu1 %1231 }
0x202b   :  { %v1234_v55 = vmul.f32 %v3117_v53, %v1232_v54 }
0x202d   :  { %1236 = vrot.lane.b32.xlu0 %v1234_v55, %s3342_s0 }
0x209f   :  { %v1237_v58 = vpop.permute.xlu0 %1236 }
0x20a0   :  { %v1239_v59 = vadd.f32 %v1237_v58, %v1229_v57 }
0x20a2   :  { %3118 = vtanh.f32 %v1239_v59  ;;  %v1313_v20 = vrot.slane %v1239_v59, 7 }
0x20ac   :  { %v3119_v60 = vpop.eup %3118 }
0x20ad   :  { %1242 = vrot.lane.b32.xlu1 %v3119_v60, %s3334_s21 }
0x211f   :  { %v1243_v61 = vpop.permute.xlu1 %1242 }
0x2120   :  { %v3750_v62 = vmul.f32 %v3117_v53, %v1243_v61 }
0x2122   :  { %v1251_v63 = vpack.c.bf16 %v3750_v62, %v3750_v62 }
0x2124   :  { %v1253_v0 = vshrl.u32 %v1251_v63, 16 }
0x2126   :  { %v1255_v4 = vrot.slane %v1253_v0, 1 }
0x2128   :  { %1256 = vrot.lane.b32.xlu0 %v1255_v4, %s3342_s0 }
0x219a   :  { %v1257_v5 = vpop.permute.xlu0 %1256 }
0x219b   :  { %2866 = vmatmul.mubr.msk.bf16.vlgmr.msra.gmra.mrb[28].mxu0 %vm178_vm3, %v1257_v5 }
0x219c   :  { %2878 = vmatpush3.bf16.msra.mxu0 %v3658_v19  ;;  %2881 = vmatprep.mubr.msk.bf16.mxu0 %vm3340_vm0, %v3339_v1 }
0x219d   :  { %2879 = vmatprep.subr.bf16.mxu0 %v3339_v1 }
0x21a0   :  { %2880 = vmatpush3.bf16.msra.mxu0 %v3668_v52 }
0x21a1   :  { %2893 = vmatprep.subr.bf16.mxu0 %v3339_v1 }
0x226e   :  { %v1295_v6 = vpop.f32.mrb[28].mxu0 }
0x226f   :  { %v1302_v10 = vrot.slane %v1295_v6, 4  ;;  %v2867_v11 = vpop.f32.mrb[29].mxu0 }
0x2270   :  { %v1298_v12 = vpop.f32.mrb[30].mxu0 }
0x2271   :  { %v1304_v13 = vadd.f32 %v1302_v10, %v3696_v33  ;;  %v2868_v9 = vpop.f32.mrb[31].mxu0 }
0x2273   :  { %3120 = vtanh.f32 %v1304_v13  ;;  %v2619_v17 = vmul.f32 -1.442695, %v1304_v13 }
0x2275   :  { %3122 = vpow2.f32 %v2619_v17 }
0x227d   :  { %v3121_v14 = vpop.eup %3120 }
0x227e   :  { %1317 = vrot.lane.b32.xlu1 %v3121_v14, %s3334_s21 }
0x227f   :  { %v3123_v2 = vpop.eup %3122 }
0x2280   :  { %v1308_v18 = vadd.f32 1.0, %v3123_v2 }
0x2282   :  { %3124 = vrcp.f32 %v1308_v18 }
0x228c   :  { %v3125_v30 = vpop.eup %3124 }
0x228d   :  { %v1315_v40 = vmul.f32 %v3125_v30, %v1313_v20 }
0x22f0   :  { %v1318_v16 = vpop.permute.xlu1 %1317 }
0x22f1   :  { %v1320_v3 = vmul.f32 %v3125_v30, %v1318_v16 }
0x22f3   :  { %1322 = vrot.lane.b32.xlu0 %v1320_v3, %s3342_s0 }
0x2365   :  { %v1323_v7 = vpop.permute.xlu0 %1322 }
0x2366   :  { %v1325_v21 = vadd.f32 %v1323_v7, %v1315_v40 }
0x2368   :  { %3126 = vtanh.f32 %v1325_v21  ;;  %v1397_v43 = vrot.slane %v1325_v21, 7 }
0x2372   :  { %v3127_v22 = vpop.eup %3126 }
0x2373   :  { %1328 = vrot.lane.b32.xlu1 %v3127_v22, %s3334_s21 }
0x23e5   :  { %v1329_v23 = vpop.permute.xlu1 %1328 }
0x23e6   :  { %v3766_v24 = vmul.f32 %v3125_v30, %v1329_v23 }
0x23e8   :  { %v1337_v25 = vpack.c.bf16 %v3766_v24, %v3766_v24 }
0x23ea   :  { %v1339_v26 = vrot.slane %v1337_v25, 2 }
0x23ec   :  { %1340 = vrot.lane.b32.xlu0 %v1339_v26, %s3342_s0 }
0x245e   :  { %v1341_v27 = vpop.permute.xlu0 %1340 }
0x245f   :  { %2874 = vmatmul.mubr.msk.bf16.vlgmr.msra.gmra.mrb[28].mxu1 %vm178_vm3, %v1341_v27 }
0x2460   :  { %2886 = vmatpush3.bf16.msra.mxu1 %v3658_v19  ;;  %2889 = vmatprep.mubr.msk.bf16.mxu1 %vm3340_vm0, %v3339_v1 }
0x2461   :  { %2887 = vmatprep.subr.bf16.mxu1 %v3339_v1 }
0x2464   :  { %2888 = vmatpush3.bf16.msra.mxu1 %v3668_v52 }
0x2465   :  { %2901 = vmatprep.subr.bf16.mxu1 %v3339_v1 }
0x2532   :  { %v1379_v28 = vpop.f32.mrb[28].mxu1 }
0x2533   :  { %v1386_v29 = vrot.slane %v1379_v28, 3  ;;  %v2875_v31 = vpop.f32.mrb[29].mxu1 }
0x2534   :  { %v1382_v32 = vpop.f32.mrb[30].mxu1 }
0x2535   :  { %v1388_v34 = vadd.f32 %v1386_v29, %v3696_v33  ;;  %v2876_v35 = vpop.f32.mrb[31].mxu1 }
0x2537   :  { %3128 = vtanh.f32 %v1388_v34  ;;  %v2621_v19 = vmul.f32 -1.442695, %v1388_v34 }
0x2539   :  { %3130 = vpow2.f32 %v2621_v19 }
0x2541   :  { %v3129_v37 = vpop.eup %3128 }
0x2542   :  { %1401 = vrot.lane.b32.xlu1 %v3129_v37, %s3334_s21 }
0x2543   :  { %v3131_v38 = vpop.eup %3130 }
0x2544   :  { %v1392_v39 = vadd.f32 1.0, %v3131_v38 }
0x2546   :  { %3132 = vrcp.f32 %v1392_v39 }
0x2550   :  { %v3133_v41 = vpop.eup %3132 }
0x2551   :  { %v1399_v44 = vmul.f32 %v3133_v41, %v1397_v43 }
0x25b4   :  { %v1402_v52 = vpop.permute.xlu1 %1401 }
0x25b5   :  { %v1404_v42 = vmul.f32 %v3133_v41, %v1402_v52  ;;  %v3825_v52 = vld [vmem:[#allocation4 + $0x8] sm:$0xff]  }
0x25b7   :  { %1406 = vrot.lane.b32.xlu0 %v1404_v42, %s3342_s0 }
0x2629   :  { %v1407_v45 = vpop.permute.xlu0 %1406 }
0x262a   :  { %v1409_v46 = vadd.f32 %v1407_v45, %v1399_v44 }
0x262c   :  { %3134 = vtanh.f32 %v1409_v46  ;;  %v1483_v12 = vrot.slane %v1409_v46, 7 }
0x2636   :  { %v3135_v47 = vpop.eup %3134 }
0x2637   :  { %1412 = vrot.lane.b32.xlu1 %v3135_v47, %s3334_s21 }
0x26a9   :  { %v1413_v48 = vpop.permute.xlu1 %1412 }
0x26aa   :  { %v3782_v49 = vmul.f32 %v3133_v41, %v1413_v48  ;;  %v3015_v41 = vld [vmem:[%s4010_s5] sm:$0xff]  }
0x26ac   :  { %v1421_v50 = vpack.c.bf16 %v3782_v49, %v3782_v49 }
0x26ae   :  { %v1423_v53 = vshrl.u32 %v1421_v50, 16 }
0x26b0   :  { %v1425_v54 = vrot.slane %v1423_v53, 2 }
0x26b2   :  { %1426 = vrot.lane.b32.xlu0 %v1425_v54, %s3342_s0 }
0x2724   :  { %v1427_v55 = vpop.permute.xlu0 %1426 }
0x2725   :  { %2882 = vmatmul.mubr.msk.bf16.vlgmr.msra.gmra.mrb[32].mxu0 %vm178_vm3, %v1427_v55 }
0x2726   :  { %2897 = vmatprep.mubr.msk.bf16.mxu0 %vm3340_vm0, %v3339_v1  ;;  %2894 = vmatpush3.bf16.msra.mxu0 %v3015_v41 }
0x2727   :  { %2895 = vmatprep.subr.bf16.mxu0 %v3339_v1 }
0x27f8   :  { %v1465_v56 = vpop.f32.mrb[32].mxu0 }
0x27f9   :  { %v1472_v57 = vrot.slane %v1465_v56, 2  ;;  %v2883_v58 = vpop.f32.mrb[33].mxu0 }
0x27fa   :  { %v1468_v59 = vpop.f32.mrb[34].mxu0 }
0x27fb   :  { %v1474_v60 = vadd.f32 %v1472_v57, %v3696_v33  ;;  %v2884_v61 = vpop.f32.mrb[35].mxu0 }
0x27fd   :  { %3136 = vtanh.f32 %v1474_v60  ;;  %v2623_v0 = vmul.f32 -1.442695, %v1474_v60 }
0x27ff   :  { %3138 = vpow2.f32 %v2623_v0 }
0x2807   :  { %v3137_v63 = vpop.eup %3136 }
0x2808   :  { %1487 = vrot.lane.b32.xlu1 %v3137_v63, %s3334_s21 }
0x2809   :  { %v3139_v4 = vpop.eup %3138 }
0x280a   :  { %v1478_v5 = vadd.f32 1.0, %v3139_v4 }
0x280c   :  { %3140 = vrcp.f32 %v1478_v5 }
0x2816   :  { %v3141_v6 = vpop.eup %3140 }
0x2817   :  { %v1485_v13 = vmul.f32 %v3141_v6, %v1483_v12 }
0x287a   :  { %v1488_v10 = vpop.permute.xlu1 %1487 }
0x287b   :  { %v1490_v11 = vmul.f32 %v3141_v6, %v1488_v10 }
0x287d   :  { %1492 = vrot.lane.b32.xlu0 %v1490_v11, %s3342_s0 }
0x28ef   :  { %v1493_v9 = vpop.permute.xlu0 %1492 }
0x28f0   :  { %v1495_v14 = vadd.f32 %v1493_v9, %v1485_v13 }
0x28f2   :  { %3142 = vtanh.f32 %v1495_v14 }
0x28fc   :  { %v3143_v17 = vpop.eup %3142 }
0x28fd   :  { %1498 = vrot.lane.b32.xlu1 %v3143_v17, %s3334_s21 }
0x296f   :  { %v1499_v2 = vpop.permute.xlu1 %1498 }
0x2970   :  { %v1501_v18 = vmul.f32 %v3141_v6, %v1499_v2 }
0x2972   :  { %v1507_v30 = vpack.c.bf16 %v1501_v18, %v1501_v18 }
0x2974   :  { %v1509_v16 = vrot.slane %v1507_v30, 3 }
0x2976   :  { %1510 = vrot.lane.b32.xlu0 %v1509_v16, %s3342_s0 }
0x29e8   :  { %v1511_v3 = vpop.permute.xlu0 %1510 }
0x29e9   :  { %2890 = vmatmul.mubr.msk.bf16.vlgmr.msra.gmra.mrb[32].mxu1 %vm178_vm3, %v1511_v3 }
0x29ea   :  { %2905 = vmatprep.mubr.msk.bf16.mxu1 %vm3340_vm0, %v3339_v1 }
0x2abc   :  { %v1549_v20 = vpop.f32.mrb[32].mxu1 }
0x2abd   :  { %v1556_v40 = vrot.slane %v1549_v20, 1  ;;  %v2891_v7 = vpop.f32.mrb[33].mxu1 }
0x2abe   :  { %v1552_v21 = vpop.f32.mrb[34].mxu1 }
0x2abf   :  { %v1558_v22 = vadd.f32 %v1556_v40, %v3696_v33  ;;  %v2892_v23 = vpop.f32.mrb[35].mxu1  ;;  %v1567_v33 = vrot.slane %v1495_v14, 7 }
0x2ac1   :  { %3144 = vtanh.f32 %v1558_v22  ;;  %v2625_v26 = vmul.f32 -1.442695, %v1558_v22 }
0x2ac3   :  { %3146 = vpow2.f32 %v2625_v26 }
0x2acb   :  { %v3145_v25 = vpop.eup %3144 }
0x2acc   :  { %1571 = vrot.lane.b32.xlu1 %v3145_v25, %s3334_s21 }
0x2acd   :  { %v3147_v27 = vpop.eup %3146 }
0x2ace   :  { %v1562_v28 = vadd.f32 1.0, %v3147_v27 }
0x2ad0   :  { %3148 = vrcp.f32 %v1562_v28 }
0x2ada   :  { %v3149_v29 = vpop.eup %3148 }
0x2adb   :  { %v1569_v34 = vmul.f32 %v3149_v29, %v1567_v33 }
0x2b3e   :  { %v1572_v31 = vpop.permute.xlu1 %1571 }
0x2b3f   :  { %v1574_v32 = vmul.f32 %v3149_v29, %v1572_v31 }
0x2b41   :  { %1576 = vrot.lane.b32.xlu0 %v1574_v32, %s3342_s0 }
0x2b45   :  { %995 = vrot.lane.b32.xlu0 %v3702_v51, %s3342_s0 }
0x2b49   :  { %1163 = vrot.lane.b32.xlu0 %v3734_v36, %s3342_s0 }
0x2b4d   :  { %1333 = vrot.lane.b32.xlu0 %v3766_v24, %s3342_s0  ;;  %v3819_v24 = vld [vmem:[#allocation4] sm:$0xff]  }
0x2b4e   :  { %2902 = vmatpush3.bf16.msra.mxu1 %v3819_v24 }
0x2b4f   :  { %2903 = vmatprep.subr.bf16.mxu1 %v3339_v1 }
0x2b51   :  { %1503 = vrot.lane.b32.xlu0 %v1501_v18, %s3342_s0 }
0x2b52   :  { %2904 = vmatpush3.bf16.msra.mxu1 %v3825_v52 }
0x2b53   :  { %2917 = vmatprep.subr.bf16.mxu1 %v3339_v1 }
0x2b55   :  { %2906 = vmatmul.mubr.bf16.vlgmr.msra.gmra.mrb[36].mxu1 %v3341_v8 }
0x2b56   :  { %2918 = vmatpush3.bf16.msra.mxu1 %v3819_v24  ;;  %2921 = vmatprep.mubr.msk.bf16.mxu1 %vm3340_vm0, %v3339_v1 }
0x2b57   :  { %2919 = vmatprep.subr.bf16.mxu1 %v3339_v1 }
0x2b5a   :  { %2920 = vmatpush3.bf16.msra.mxu1 %v3825_v52 }
0x2b5b   :  { %2933 = vmatprep.subr.bf16.mxu1 %v3339_v1 }
0x2bb3   :  { %v1577_v35 = vpop.permute.xlu0 %1576 }
0x2bb4   :  { %v1579_v37 = vadd.f32 %v1577_v35, %v1569_v34 }
0x2bb6   :  { %3150 = vtanh.f32 %v1579_v37 }
0x2bb7   :  { %v996_v19 = vpop.permute.xlu0 %995 }
0x2bb8   :  { %998 = vst.msk [vmem:[#allocation2] sm:$0x1] %vm251_vm4, %v996_v19 }
0x2bbb   :  { %v1164_v38 = vpop.permute.xlu0 %1163 }
0x2bbc   :  { %1166 = vst.msk [vmem:[#allocation2] sm:$0x4] %vm421_vm5, %v1164_v38 }
0x2bbf   :  { %v1334_v51 = vpop.permute.xlu0 %1333 }
0x2bc0   :  { %v3151_v39 = vpop.eup %3150  ;;  %1336 = vst.msk [vmem:[#allocation2] sm:$0x10] %vm593_vm6, %v1334_v51 }
0x2bc1   :  { %1582 = vrot.lane.b32.xlu1 %v3151_v39, %s3334_s21 }
0x2bc3   :  { %v1504_v36 = vpop.permute.xlu0 %1503 }
0x2bc4   :  { %1506 = vst.msk [vmem:[#allocation2] sm:$0x40] %vm765_vm7, %v1504_v36 }
0x2bc5   :  { %1078 = vrot.lane.b32.xlu1 %v3718_v15, %s3342_s0  ;;  %v3017_v15 = vld [vmem:[%s4010_s5 + $0x8] sm:$0xff]  }
0x2bc6   :  { %2896 = vmatpush3.bf16.msra.mxu0 %v3017_v15 }
0x2bc7   :  { %2909 = vmatprep.subr.bf16.mxu0 %v3339_v1 }
0x2bc9   :  { %1247 = vrot.lane.b32.xlu1 %v3750_v62, %s3342_s0 }
0x2bcd   :  { %1417 = vrot.lane.b32.xlu1 %v3782_v49, %s3342_s0 }
0x2c28   :  { %v1702_v48 = vpop.f32.mrb[36].mxu1 }
0x2c29   :  { %v2907_v49 = vpop.f32.mrb[37].mxu1 }
0x2c2a   :  { %v1705_v50 = vpop.f32.mrb[38].mxu1 }
0x2c2b   :  { %v2908_v53 = vpop.f32.mrb[39].mxu1 }
0x2c33   :  { %v1583_v62 = vpop.permute.xlu1 %1582 }
0x2c34   :  { %v1585_v42 = vmul.f32 %v3149_v29, %v1583_v62 }
0x2c36   :  { %1587 = vrot.lane.b32.xlu1 %v1585_v42, %s3342_s0 }
0x2c37   :  { %v1079_v43 = vpop.permute.xlu1 %1078 }
0x2c38   :  { %1081 = vst.msk [vmem:[#allocation2] sm:$0x2] %vm335_vm8, %v1079_v43 }
0x2c3b   :  { %v1248_v8 = vpop.permute.xlu1 %1247 }
0x2c3c   :  { %1250 = vst.msk [vmem:[#allocation2] sm:$0x8] %vm506_vm9, %v1248_v8 }
0x2c3f   :  { %v1418_v44 = vpop.permute.xlu1 %1417 }
0x2c40   :  { %1420 = vst.msk [vmem:[#allocation2] sm:$0x20] %vm678_vm10, %v1418_v44 }
0x2ca8   :  { %v1588_v45 = vpop.permute.xlu1 %1587 }
0x2ca9   :  { %1590 = vst.msk [vmem:[#allocation2] sm:$0x80] %vm850_vm11, %v1588_v45 }
0x2cb0   :  { %v1591_v46 = vld [vmem:[#allocation2] sm:$0xff] }
0x2cb1   :  { %v1592_v47 = vpack.c.bf16 %v1591_v46, %v1591_v46 }
0x2cb3   :  { %2898 = vmatmul.mubr.msk.bf16.vlgmr.msra.gmra.mrb[36].mxu0 %vm178_vm3, %v1592_v47 }
0x2cb4   :  { %2910 = vmatpush3.bf16.msra.mxu0 %v3819_v24  ;;  %2913 = vmatprep.mubr.msk.bf16.mxu0 %vm3340_vm0, %v3339_v1 }
0x2cb5   :  { %2911 = vmatprep.subr.bf16.mxu0 %v3339_v1 }
0x2cb8   :  { %2912 = vmatpush3.bf16.msra.mxu0 %v3825_v52 }
0x2cb9   :  { %2925 = vmatprep.subr.bf16.mxu0 %v3339_v1 }
0x2d86   :  { %v3854_v54 = vpop.f32.mrb[36].mxu0 }
0x2d87   :  { %v2899_v55 = vpop.f32.mrb[37].mxu0  ;;  %v1708_v56 = vadd.f32 %v1702_v48, %v3854_v54 }
0x2d88   :  { %v1649_v57 = vpop.f32.mrb[38].mxu0 }
0x2d89   :  { %v2900_v58 = vpop.f32.mrb[39].mxu0  ;;  %3152 = vtanh.f32 %v1708_v56  ;;  %v2631_v60 = vmul.f32 -1.442695, %v1708_v56 }
0x2d8b   :  { %3154 = vpow2.f32 %v2631_v60 }
0x2d93   :  { %v3153_v59 = vpop.eup %3152 }
0x2d94   :  { %1718 = vrot.lane.b32.xlu0 %v3153_v59, %s3334_s21 }
0x2d95   :  { %v3155_v61 = vpop.eup %3154 }
0x2d96   :  { %v1712_v63 = vadd.f32 1.0, %v3155_v61 }
0x2d98   :  { %3156 = vrcp.f32 %v1712_v63 }
0x2da2   :  { %v3157_v0 = vpop.eup %3156 }
0x2da3   :  { %v1716_v6 = vmul.f32 0.0, %v3157_v0 }
0x2e06   :  { %v1719_v4 = vpop.permute.xlu0 %1718 }
0x2e07   :  { %v1721_v5 = vmul.f32 %v3157_v0, %v1719_v4 }
0x2e09   :  { %1723 = vrot.lane.b32.xlu1 %v1721_v5, %s3342_s0 }
0x2e7b   :  { %v1724_v10 = vpop.permute.xlu1 %1723 }
0x2e7c   :  { %v1726_v11 = vadd.f32 %v1724_v10, %v1716_v6 }
0x2e7e   :  { %3158 = vtanh.f32 %v1726_v11  ;;  %v1797_v27 = vrot.slane %v1726_v11, 7 }
0x2e88   :  { %v3159_v12 = vpop.eup %3158 }
0x2e89   :  { %1729 = vrot.lane.b32.xlu0 %v3159_v12, %s3334_s21 }
0x2efb   :  { %v1730_v13 = vpop.permute.xlu0 %1729 }
0x2efc   :  { %v3860_v9 = vmul.f32 %v3157_v0, %v1730_v13 }
0x2efe   :  { %v1738_v14 = vpack.c.bf16 %v3860_v9, %v3860_v9 }
0x2f00   :  { %1740 = vrot.lane.b32.xlu1 %v1738_v14, %s3342_s0 }
0x2f72   :  { %v1741_v17 = vpop.permute.xlu1 %1740 }
0x2f73   :  { %2914 = vmatmul.mubr.msk.bf16.vlgmr.msra.gmra.mrb[40].mxu0 %vm178_vm3, %v1741_v17 }
0x2f74   :  { %2926 = vmatpush3.bf16.msra.mxu0 %v3819_v24  ;;  %2929 = vmatprep.mubr.msk.bf16.mxu0 %vm3340_vm0, %v3339_v1 }
0x2f75   :  { %2927 = vmatprep.subr.bf16.mxu0 %v3339_v1 }
0x2f78   :  { %2928 = vmatpush3.bf16.msra.mxu0 %v3825_v52 }
0x2f79   :  { %2941 = vmatprep.subr.bf16.mxu0 %v3339_v1 }
0x3046   :  { %v1779_v2 = vpop.f32.mrb[40].mxu0 }
0x3047   :  { %v1786_v18 = vrot.slane %v1779_v2, 7  ;;  %v2915_v30 = vpop.f32.mrb[41].mxu0 }
0x3048   :  { %v1782_v16 = vpop.f32.mrb[42].mxu0 }
0x3049   :  { %v1788_v3 = vadd.f32 %v1786_v18, %v3854_v54  ;;  %v2916_v20 = vpop.f32.mrb[43].mxu0 }
0x304b   :  { %3160 = vtanh.f32 %v1788_v3  ;;  %v2633_v7 = vmul.f32 -1.442695, %v1788_v3 }
0x304d   :  { %3162 = vpow2.f32 %v2633_v7 }
0x3055   :  { %v3161_v40 = vpop.eup %3160 }
0x3056   :  { %1801 = vrot.lane.b32.xlu0 %v3161_v40, %s3334_s21 }
0x3057   :  { %v3163_v21 = vpop.eup %3162 }
0x3058   :  { %v1792_v22 = vadd.f32 1.0, %v3163_v21 }
0x305a   :  { %3164 = vrcp.f32 %v1792_v22 }
0x3064   :  { %v3165_v23 = vpop.eup %3164 }
0x3065   :  { %v1799_v28 = vmul.f32 %v3165_v23, %v1797_v27 }
0x30c8   :  { %v1802_v25 = vpop.permute.xlu0 %1801 }
0x30c9   :  { %v1804_v26 = vmul.f32 %v3165_v23, %v1802_v25 }
0x30cb   :  { %1806 = vrot.lane.b32.xlu1 %v1804_v26, %s3342_s0 }
0x313d   :  { %v1807_v29 = vpop.permute.xlu1 %1806 }
0x313e   :  { %v1809_v31 = vadd.f32 %v1807_v29, %v1799_v28 }
0x3140   :  { %3166 = vtanh.f32 %v1809_v31  ;;  %v1882_v47 = vrot.slane %v1809_v31, 7 }
0x314a   :  { %v3167_v32 = vpop.eup %3166 }
0x314b   :  { %1812 = vrot.lane.b32.xlu0 %v3167_v32, %s3334_s21 }
0x31bd   :  { %v1813_v33 = vpop.permute.xlu0 %1812 }
0x31be   :  { %v3876_v34 = vmul.f32 %v3165_v23, %v1813_v33 }
0x31c0   :  { %v1821_v35 = vpack.c.bf16 %v3876_v34, %v3876_v34 }
0x31c2   :  { %v1823_v37 = vshrl.u32 %v1821_v35, 16 }
0x31c4   :  { %1825 = vrot.lane.b32.xlu1 %v1823_v37, %s3342_s0 }
0x3236   :  { %v1826_v19 = vpop.permute.xlu1 %1825 }
0x3237   :  { %2922 = vmatmul.mubr.msk.bf16.vlgmr.msra.gmra.mrb[40].mxu1 %vm178_vm3, %v1826_v19 }
0x3238   :  { %2934 = vmatpush3.bf16.msra.mxu1 %v3819_v24  ;;  %2937 = vmatprep.mubr.msk.bf16.mxu1 %vm3340_vm0, %v3339_v1 }
0x3239   :  { %2935 = vmatprep.subr.bf16.mxu1 %v3339_v1 }
0x323c   :  { %2936 = vmatpush3.bf16.msra.mxu1 %v3825_v52 }
0x323d   :  { %2949 = vmatprep.subr.bf16.mxu1 %v3339_v1 }
0x330a   :  { %v1864_v38 = vpop.f32.mrb[40].mxu1 }
0x330b   :  { %v1871_v51 = vrot.slane %v1864_v38, 6  ;;  %v2923_v39 = vpop.f32.mrb[41].mxu1 }
0x330c   :  { %v1867_v36 = vpop.f32.mrb[42].mxu1 }
0x330d   :  { %v1873_v41 = vadd.f32 %v1871_v51, %v3854_v54  ;;  %v2924_v15 = vpop.f32.mrb[43].mxu1 }
0x330f   :  { %3168 = vtanh.f32 %v1873_v41  ;;  %v2635_v42 = vmul.f32 -1.442695, %v1873_v41 }
0x3311   :  { %3170 = vpow2.f32 %v2635_v42 }
0x3319   :  { %v3169_v62 = vpop.eup %3168 }
0x331a   :  { %1886 = vrot.lane.b32.xlu0 %v3169_v62, %s3334_s21 }
0x331b   :  { %v3171_v43 = vpop.eup %3170 }
0x331c   :  { %v1877_v8 = vadd.f32 1.0, %v3171_v43 }
0x331e   :  { %3172 = vrcp.f32 %v1877_v8 }
0x3328   :  { %v3173_v44 = vpop.eup %3172 }
0x3329   :  { %v1884_v48 = vmul.f32 %v3173_v44, %v1882_v47 }
0x338c   :  { %v1887_v45 = vpop.permute.xlu0 %1886 }
0x338d   :  { %v1889_v46 = vmul.f32 %v3173_v44, %v1887_v45 }
0x338f   :  { %1891 = vrot.lane.b32.xlu1 %v1889_v46, %s3342_s0 }
0x3401   :  { %v1892_v49 = vpop.permute.xlu1 %1891 }
0x3402   :  { %v1894_v50 = vadd.f32 %v1892_v49, %v1884_v48 }
0x3404   :  { %3174 = vtanh.f32 %v1894_v50  ;;  %v1966_v2 = vrot.slane %v1894_v50, 7 }
0x340e   :  { %v3175_v53 = vpop.eup %3174 }
0x340f   :  { %1897 = vrot.lane.b32.xlu0 %v3175_v53, %s3334_s21 }
0x3481   :  { %v1898_v55 = vpop.permute.xlu0 %1897 }
0x3482   :  { %v3892_v56 = vmul.f32 %v3173_v44, %v1898_v55 }
0x3484   :  { %v1906_v57 = vpack.c.bf16 %v3892_v56, %v3892_v56 }
0x3486   :  { %v1908_v58 = vrot.slane %v1906_v57, 1 }
0x3488   :  { %1909 = vrot.lane.b32.xlu1 %v1908_v58, %s3342_s0 }
0x34fa   :  { %v1910_v59 = vpop.permute.xlu1 %1909 }
0x34fb   :  { %2930 = vmatmul.mubr.msk.bf16.vlgmr.msra.gmra.mrb[44].mxu0 %vm178_vm3, %v1910_v59 }
0x34fc   :  { %2942 = vmatpush3.bf16.msra.mxu0 %v3819_v24  ;;  %2945 = vmatprep.mubr.msk.bf16.mxu0 %vm3340_vm0, %v3339_v1 }
0x34fd   :  { %2943 = vmatprep.subr.bf16.mxu0 %v3339_v1 }
0x3500   :  { %2944 = vmatpush3.bf16.msra.mxu0 %v3825_v52 }
0x3501   :  { %2957 = vmatprep.subr.bf16.mxu0 %v3339_v1 }
0x35ce   :  { %v1948_v60 = vpop.f32.mrb[44].mxu0 }
0x35cf   :  { %v1955_v61 = vrot.slane %v1948_v60, 5  ;;  %v2931_v63 = vpop.f32.mrb[45].mxu0 }
0x35d0   :  { %v1951_v0 = vpop.f32.mrb[46].mxu0 }
0x35d1   :  { %v1957_v4 = vadd.f32 %v1955_v61, %v3854_v54  ;;  %v2932_v5 = vpop.f32.mrb[47].mxu0 }
0x35d3   :  { %3176 = vtanh.f32 %v1957_v4  ;;  %v2637_v10 = vmul.f32 -1.442695, %v1957_v4 }
0x35d5   :  { %3178 = vpow2.f32 %v2637_v10 }
0x35dd   :  { %v3177_v6 = vpop.eup %3176 }
0x35de   :  { %1970 = vrot.lane.b32.xlu0 %v3177_v6, %s3334_s21 }
0x35df   :  { %v3179_v11 = vpop.eup %3178 }
0x35e0   :  { %v1961_v12 = vadd.f32 1.0, %v3179_v11 }
0x35e2   :  { %3180 = vrcp.f32 %v1961_v12 }
0x35ec   :  { %v3181_v13 = vpop.eup %3180 }
0x35ed   :  { %v1968_v18 = vmul.f32 %v3181_v13, %v1966_v2 }
0x3650   :  { %v1971_v14 = vpop.permute.xlu0 %1970 }
0x3651   :  { %v1973_v17 = vmul.f32 %v3181_v13, %v1971_v14 }
0x3653   :  { %1975 = vrot.lane.b32.xlu1 %v1973_v17, %s3342_s0 }
0x36c5   :  { %v1976_v30 = vpop.permute.xlu1 %1975 }
0x36c6   :  { %v1978_v16 = vadd.f32 %v1976_v30, %v1968_v18 }
0x36c8   :  { %3182 = vtanh.f32 %v1978_v16  ;;  %v2052_v39 = vrot.slane %v1978_v16, 7 }
0x36d2   :  { %v3183_v3 = vpop.eup %3182 }
0x36d3   :  { %1981 = vrot.lane.b32.xlu0 %v3183_v3, %s3334_s21 }
0x3745   :  { %v1982_v20 = vpop.permute.xlu0 %1981 }
0x3746   :  { %v3908_v40 = vmul.f32 %v3181_v13, %v1982_v20 }
0x3748   :  { %v1990_v7 = vpack.c.bf16 %v3908_v40, %v3908_v40 }
0x374a   :  { %v1992_v21 = vshrl.u32 %v1990_v7, 16 }
0x374c   :  { %v1994_v22 = vrot.slane %v1992_v21, 1 }
0x374e   :  { %1995 = vrot.lane.b32.xlu1 %v1994_v22, %s3342_s0 }
0x37c0   :  { %v1996_v23 = vpop.permute.xlu1 %1995 }
0x37c1   :  { %2938 = vmatmul.mubr.msk.bf16.vlgmr.msra.gmra.mrb[44].mxu1 %vm178_vm3, %v1996_v23 }
0x37c2   :  { %2950 = vmatpush3.bf16.msra.mxu1 %v3819_v24  ;;  %2953 = vmatprep.mubr.msk.bf16.mxu1 %vm3340_vm0, %v3339_v1 }
0x37c3   :  { %2951 = vmatprep.subr.bf16.mxu1 %v3339_v1 }
0x37c6   :  { %2952 = vmatpush3.bf16.msra.mxu1 %v3825_v52 }
0x37c7   :  { %2965 = vmatprep.subr.bf16.mxu1 %v3339_v1 }
0x3894   :  { %v2034_v25 = vpop.f32.mrb[44].mxu1 }
0x3895   :  { %v2041_v26 = vrot.slane %v2034_v25, 4  ;;  %v2939_v27 = vpop.f32.mrb[45].mxu1 }
0x3896   :  { %v2037_v28 = vpop.f32.mrb[46].mxu1 }
0x3897   :  { %v2043_v29 = vadd.f32 %v2041_v26, %v3854_v54  ;;  %v2940_v31 = vpop.f32.mrb[47].mxu1 }
0x3899   :  { %3184 = vtanh.f32 %v2043_v29  ;;  %v2639_v33 = vmul.f32 -1.442695, %v2043_v29 }
0x389b   :  { %3186 = vpow2.f32 %v2639_v33 }
0x38a3   :  { %v3185_v32 = vpop.eup %3184 }
0x38a4   :  { %2056 = vrot.lane.b32.xlu0 %v3185_v32, %s3334_s21 }
0x38a5   :  { %v3187_v35 = vpop.eup %3186 }
0x38a6   :  { %v2047_v37 = vadd.f32 1.0, %v3187_v35 }
0x38a8   :  { %3188 = vrcp.f32 %v2047_v37 }
0x38b2   :  { %v3189_v19 = vpop.eup %3188 }
0x38b3   :  { %v2054_v36 = vmul.f32 %v3189_v19, %v2052_v39 }
0x3916   :  { %v2057_v38 = vpop.permute.xlu0 %2056 }
0x3917   :  { %v2059_v51 = vmul.f32 %v3189_v19, %v2057_v38 }
0x3919   :  { %2061 = vrot.lane.b32.xlu1 %v2059_v51, %s3342_s0 }
0x398b   :  { %v2062_v41 = vpop.permute.xlu1 %2061 }
0x398c   :  { %v2064_v15 = vadd.f32 %v2062_v41, %v2054_v36 }
0x398e   :  { %3190 = vtanh.f32 %v2064_v15  ;;  %v2136_v61 = vrot.slane %v2064_v15, 7 }
0x3998   :  { %v3191_v62 = vpop.eup %3190 }
0x3999   :  { %2067 = vrot.lane.b32.xlu0 %v3191_v62, %s3334_s21 }
0x3a0b   :  { %v2068_v42 = vpop.permute.xlu0 %2067 }
0x3a0c   :  { %v3924_v43 = vmul.f32 %v3189_v19, %v2068_v42 }
0x3a0e   :  { %v2076_v8 = vpack.c.bf16 %v3924_v43, %v3924_v43 }
0x3a10   :  { %v2078_v44 = vrot.slane %v2076_v8, 2 }
0x3a12   :  { %2079 = vrot.lane.b32.xlu1 %v2078_v44, %s3342_s0 }
0x3a84   :  { %v2080_v45 = vpop.permute.xlu1 %2079 }
0x3a85   :  { %2946 = vmatmul.mubr.msk.bf16.vlgmr.msra.gmra.mrb[48].mxu0 %vm178_vm3, %v2080_v45 }
0x3a86   :  { %2958 = vmatpush3.bf16.msra.mxu0 %v3819_v24  ;;  %2961 = vmatprep.mubr.msk.bf16.mxu0 %vm3340_vm0, %v3339_v1 }
0x3a87   :  { %2959 = vmatprep.subr.bf16.mxu0 %v3339_v1 }
0x3a8a   :  { %2960 = vmatpush3.bf16.msra.mxu0 %v3825_v52 }
0x3a8b   :  { %2973 = vmatprep.subr.bf16.mxu0 %v3339_v1 }
0x3b58   :  { %v2118_v46 = vpop.f32.mrb[48].mxu0 }
0x3b59   :  { %v2125_v47 = vrot.slane %v2118_v46, 3  ;;  %v2947_v48 = vpop.f32.mrb[49].mxu0 }
0x3b5a   :  { %v2121_v49 = vpop.f32.mrb[50].mxu0 }
0x3b5b   :  { %v2127_v50 = vadd.f32 %v2125_v47, %v3854_v54  ;;  %v2948_v53 = vpop.f32.mrb[51].mxu0 }
0x3b5d   :  { %3192 = vtanh.f32 %v2127_v50  ;;  %v2641_v24 = vmul.f32 -1.442695, %v2127_v50 }
0x3b5f   :  { %3194 = vpow2.f32 %v2641_v24 }
0x3b67   :  { %v3193_v55 = vpop.eup %3192 }
0x3b68   :  { %2140 = vrot.lane.b32.xlu0 %v3193_v55, %s3334_s21 }
0x3b69   :  { %v3195_v57 = vpop.eup %3194 }
0x3b6a   :  { %v2131_v58 = vadd.f32 1.0, %v3195_v57 }
0x3b6c   :  { %3196 = vrcp.f32 %v2131_v58  ;;  %v3019_v58 = vld [vmem:[#allocation6 + $0x8] sm:$0xff]  }
0x3b76   :  { %v3197_v59 = vpop.eup %3196 }
0x3b77   :  { %v2138_v63 = vmul.f32 %v3197_v59, %v2136_v61 }
0x3bda   :  { %v2141_v52 = vpop.permute.xlu0 %2140 }
0x3bdb   :  { %v2143_v60 = vmul.f32 %v3197_v59, %v2141_v52 }
0x3bdd   :  { %2145 = vrot.lane.b32.xlu1 %v2143_v60, %s3342_s0 }
0x3c4f   :  { %v2146_v0 = vpop.permute.xlu1 %2145 }
0x3c50   :  { %v2148_v4 = vadd.f32 %v2146_v0, %v2138_v63 }
0x3c52   :  { %3198 = vtanh.f32 %v2148_v4  ;;  %v2222_v27 = vrot.slane %v2148_v4, 7  ;;  %v3020_v4 = vld [vmem:[#allocation9] sm:$0xff]  }
0x3c5c   :  { %v3199_v5 = vpop.eup %3198 }
0x3c5d   :  { %2151 = vrot.lane.b32.xlu0 %v3199_v5, %s3334_s21  ;;  %v2646_v5 = vld [vmem:[#allocation8] ss:$0 sm:$0xff] }
0x3ccf   :  { %v2152_v6 = vpop.permute.xlu0 %2151 }
0x3cd0   :  { %v3940_v10 = vmul.f32 %v3197_v59, %v2152_v6 }
0x3cd2   :  { %v2160_v11 = vpack.c.bf16 %v3940_v10, %v3940_v10 }
0x3cd4   :  { %v2162_v12 = vshrl.u32 %v2160_v11, 16 }
0x3cd6   :  { %v2164_v13 = vrot.slane %v2162_v12, 2 }
0x3cd8   :  { %2165 = vrot.lane.b32.xlu1 %v2164_v13, %s3342_s0 }
0x3d4a   :  { %v2166_v14 = vpop.permute.xlu1 %2165 }
0x3d4b   :  { %2954 = vmatmul.mubr.msk.bf16.vlgmr.msra.gmra.mrb[48].mxu1 %vm178_vm3, %v2166_v14 }
0x3d4c   :  { %2969 = vmatprep.mubr.msk.bf16.mxu1 %vm3340_vm0, %v3339_v1 }
0x3e1e   :  { %v2204_v17 = vpop.f32.mrb[48].mxu1 }
0x3e1f   :  { %v2211_v2 = vrot.slane %v2204_v17, 2  ;;  %v2955_v18 = vpop.f32.mrb[49].mxu1  ;;  %v3021_v17 = vld [vmem:[#allocation9 + $0x8] sm:$0xff]  }
0x3e20   :  { %v2207_v30 = vpop.f32.mrb[50].mxu1 }
0x3e21   :  { %v2213_v16 = vadd.f32 %v2211_v2, %v3854_v54  ;;  %v2956_v3 = vpop.f32.mrb[51].mxu1  ;;  %v3022_v2 = vld [vmem:[%s4016_s11] sm:$0xff]  }
0x3e23   :  { %3200 = vtanh.f32 %v2213_v16  ;;  %v2643_v7 = vmul.f32 -1.442695, %v2213_v16 }
0x3e25   :  { %3202 = vpow2.f32 %v2643_v7 }
0x3e2d   :  { %v3201_v20 = vpop.eup %3200 }
0x3e2e   :  { %2226 = vrot.lane.b32.xlu0 %v3201_v20, %s3334_s21 }
0x3e2f   :  { %v3203_v21 = vpop.eup %3202 }
0x3e30   :  { %v2217_v22 = vadd.f32 1.0, %v3203_v21 }
0x3e32   :  { %3204 = vrcp.f32 %v2217_v22  ;;  %v3023_v22 = vld [vmem:[%s4016_s11 + $0x8] sm:$0xff]  }
0x3e3c   :  { %v3205_v23 = vpop.eup %3204 }
0x3e3d   :  { %v2224_v28 = vmul.f32 %v3205_v23, %v2222_v27 }
0x3ea0   :  { %v2227_v25 = vpop.permute.xlu0 %2226 }
0x3ea1   :  { %v2229_v26 = vmul.f32 %v3205_v23, %v2227_v25 }
0x3ea3   :  { %2231 = vrot.lane.b32.xlu1 %v2229_v26, %s3342_s0 }
0x3f15   :  { %v2232_v29 = vpop.permute.xlu1 %2231 }
0x3f16   :  { %v2234_v31 = vadd.f32 %v2232_v29, %v2224_v28 }
0x3f18   :  { %3206 = vtanh.f32 %v2234_v31 }
0x3f22   :  { %v3207_v32 = vpop.eup %3206 }
0x3f23   :  { %2237 = vrot.lane.b32.xlu0 %v3207_v32, %s3334_s21  ;;  %v2655_v32 = vld [vmem:[#allocation3] ss:$0 sm:$0xff] }
0x3f95   :  { %v2238_v33 = vpop.permute.xlu0 %2237 }
0x3f96   :  { %v2240_v35 = vmul.f32 %v3205_v23, %v2238_v33  ;;  %v2651_v23 = vld [vmem:[#allocation11] ss:$0 sm:$0xff] }
0x3f98   :  { %v2246_v37 = vpack.c.bf16 %v2240_v35, %v2240_v35 }
0x3f9a   :  { %v2248_v19 = vrot.slane %v2246_v37, 3 }
0x3f9c   :  { %2249 = vrot.lane.b32.xlu1 %v2248_v19, %s3342_s0 }
0x400e   :  { %v2250_v38 = vpop.permute.xlu1 %2249 }
0x400f   :  { %2962 = vmatmul.mubr.msk.bf16.vlgmr.msra.gmra.mrb[52].mxu0 %vm178_vm3, %v2250_v38 }
0x4010   :  { %2977 = vmatprep.mubr.msk.bf16.mxu0 %vm3340_vm0, %v3339_v1 }
0x40e2   :  { %v2288_v51 = vpop.f32.mrb[52].mxu0 }
0x40e3   :  { %v2295_v39 = vrot.slane %v2288_v51, 1  ;;  %v2963_v36 = vpop.f32.mrb[53].mxu0 }
0x40e4   :  { %v2291_v41 = vpop.f32.mrb[54].mxu0 }
0x40e5   :  { %v2297_v15 = vadd.f32 %v2295_v39, %v3854_v54  ;;  %v2964_v62 = vpop.f32.mrb[55].mxu0  ;;  %v2306_v54 = vrot.slane %v2234_v31, 7 }
0x40e7   :  { %3208 = vtanh.f32 %v2297_v15  ;;  %v2645_v8 = vmul.f32 -1.442695, %v2297_v15 }
0x40e9   :  { %3210 = vpow2.f32 %v2645_v8 }
0x40f1   :  { %v3209_v42 = vpop.eup %3208 }
0x40f2   :  { %2310 = vrot.lane.b32.xlu0 %v3209_v42, %s3334_s21 }
0x40f3   :  { %v3211_v44 = vpop.eup %3210 }
0x40f4   :  { %v2301_v45 = vadd.f32 1.0, %v3211_v44 }
0x40f6   :  { %3212 = vrcp.f32 %v2301_v45 }
0x4100   :  { %v3213_v46 = vpop.eup %3212 }
0x4101   :  { %v2308_v49 = vmul.f32 %v3213_v46, %v2306_v54 }
0x4164   :  { %v2311_v47 = vpop.permute.xlu0 %2310 }
0x4165   :  { %v2313_v48 = vmul.f32 %v3213_v46, %v2311_v47 }
0x4167   :  { %2315 = vrot.lane.b32.xlu1 %v2313_v48, %s3342_s0 }
0x416b   :  { %1734 = vrot.lane.b32.xlu1 %v3860_v9, %s3342_s0 }
0x416f   :  { %1902 = vrot.lane.b32.xlu1 %v3892_v56, %s3342_s0 }
0x4173   :  { %2072 = vrot.lane.b32.xlu1 %v3924_v43, %s3342_s0  ;;  %v3018_v43 = vld [vmem:[#allocation6] sm:$0xff]  }
0x4174   :  { %2966 = vmatpush3.bf16.msra.mxu1 %v3018_v43  ;;  %2974 = vmatpush3.bf16.msra.mxu0 %v3018_v43 }
0x4175   :  { %2967 = vmatprep.subr.bf16.mxu1 %v3339_v1  ;;  %2975 = vmatprep.subr.bf16.mxu0 %v3339_v1 }
0x4177   :  { %2242 = vrot.lane.b32.xlu1 %v2240_v35, %s3342_s0 }
0x4178   :  { %2968 = vmatpush3.bf16.msra.mxu1 %v3019_v58  ;;  %2976 = vmatpush3.bf16.msra.mxu0 %v3019_v58 }
0x4179   :  { %2981 = vmatprep.subr.bf16.mxu1 %v3339_v1  ;;  %2989 = vmatprep.subr.bf16.mxu0 %v3339_v1 }
0x41d9   :  { %v2316_v50 = vpop.permute.xlu1 %2315 }
0x41da   :  { %v2318_v53 = vadd.f32 %v2316_v50, %v2308_v49 }
0x41dc   :  { %3214 = vtanh.f32 %v2318_v53 }
0x41dd   :  { %v1735_v55 = vpop.permute.xlu1 %1734 }
0x41de   :  { %1737 = vst.msk [vmem:[#allocation2] sm:$0x1] %vm251_vm4, %v1735_v55 }
0x41e1   :  { %v1903_v24 = vpop.permute.xlu1 %1902 }
0x41e2   :  { %1905 = vst.msk [vmem:[#allocation2] sm:$0x4] %vm421_vm5, %v1903_v24 }
0x41e5   :  { %v2073_v9 = vpop.permute.xlu1 %2072 }
0x41e6   :  { %v3215_v57 = vpop.eup %3214  ;;  %2075 = vst.msk [vmem:[#allocation2] sm:$0x10] %vm593_vm6, %v2073_v9 }
0x41e7   :  { %2321 = vrot.lane.b32.xlu0 %v3215_v57, %s3334_s21 }
0x41e9   :  { %v2243_v56 = vpop.permute.xlu1 %2242 }
0x41ea   :  { %2245 = vst.msk [vmem:[#allocation2] sm:$0x40] %vm765_vm7, %v2243_v56 }
0x41eb   :  { %1817 = vrot.lane.b32.xlu0 %v3876_v34, %s3342_s0 }
0x41ef   :  { %1986 = vrot.lane.b32.xlu0 %v3908_v40, %s3342_s0 }
0x41f3   :  { %2156 = vrot.lane.b32.xlu0 %v3940_v10, %s3342_s0 }
0x4259   :  { %v2322_v34 = vpop.permute.xlu0 %2321 }
0x425a   :  { %v2324_v59 = vmul.f32 %v3213_v46, %v2322_v34 }
0x425c   :  { %2326 = vrot.lane.b32.xlu0 %v2324_v59, %s3342_s0 }
0x425d   :  { %v1818_v40 = vpop.permute.xlu0 %1817 }
0x425e   :  { %1820 = vst.msk [vmem:[#allocation2] sm:$0x2] %vm335_vm8, %v1818_v40 }
0x4261   :  { %v1987_v52 = vpop.permute.xlu0 %1986 }
0x4262   :  { %1989 = vst.msk [vmem:[#allocation2] sm:$0x8] %vm506_vm9, %v1987_v52 }
0x4265   :  { %v2157_v60 = vpop.permute.xlu0 %2156 }
0x4266   :  { %2159 = vst.msk [vmem:[#allocation2] sm:$0x20] %vm678_vm10, %v2157_v60 }
0x42ce   :  { %v2327_v61 = vpop.permute.xlu0 %2326 }
0x42cf   :  { %2329 = vst.msk [vmem:[#allocation2] sm:$0x80] %vm850_vm11, %v2327_v61 }
0x42d6   :  { %v2330_v63 = vld [vmem:[#allocation2] sm:$0xff] }
0x42d7   :  { %v2336_v0 = vpack.c.bf16 %v2330_v63, %v2330_v63 }
0x42d9   :  { %2970 = vmatmul.mubr.msk.bf16.vlgmr.msra.gmra.mrb[52].mxu1 %vm178_vm3, %v2336_v0 }
0x42da   :  { %2985 = vmatprep.mubr.msk.bf16.mxu1 %vm3340_vm0, %v3339_v1  ;;  %2982 = vmatpush3.bf16.msra.mxu1 %v3020_v4 }
0x42db   :  { %2983 = vmatprep.subr.bf16.mxu1 %v3339_v1 }
0x42de   :  { %2984 = vmatpush3.bf16.msra.mxu1 %v3021_v17 }
0x43ac   :  { %v2392_v6 = vpop.f32.mrb[52].mxu1 }
0x43ad   :  { %v2393_v10 = vadd.f32 %v2646_v5, %v2392_v6  ;;  %v2971_v11 = vpop.f32.mrb[53].mxu1 }
0x43ae   :  { %v2395_v12 = vpop.f32.mrb[54].mxu1 }
0x43af   :  { %v2398_v13 = vpack.c.bf16 %v2393_v10, %v2393_v10  ;;  %v2972_v14 = vpop.f32.mrb[55].mxu1 }
0x43b1   :  { %2978 = vmatmul.mubr.msk.bf16.vlgmr.msra.gmra.mrb[56].mxu0 %vm178_vm3, %v2398_v13 }
0x43b2   :  { %2993 = vmatprep.mubr.msk.bf16.mxu0 %vm3340_vm0, %v3339_v1  ;;  %2990 = vmatpush3.bf16.msra.mxu0 %v3022_v2 }
0x43b3   :  { %2991 = vmatprep.subr.bf16.mxu0 %v3339_v1 }
0x43b6   :  { %2992 = vmatpush3.bf16.msra.mxu0 %v3023_v22 }
0x4484   :  { %v2436_v18 = vpop.f32.mrb[56].mxu0 }
0x4485   :  { %v2437_v30 = vadd.f32 %v2646_v5, %v2436_v18  ;;  %v2979_v16 = vpop.f32.mrb[57].mxu0 }
0x4486   :  { %v2439_v3 = vpop.f32.mrb[58].mxu0 }
0x4487   :  { %v2442_v20 = vmax.f32 %v2437_v30, 0.0  ;;  %v2980_v7 = vpop.f32.mrb[59].mxu0 }
0x4489   :  { %v2443_v21 = vpack.c.bf16 %v2442_v20, %v2442_v20 }
0x448b   :  { %2986 = vmatmul.mubr.msk.bf16.vlgmr.msra.gmra.mrb[56].mxu1 %vm178_vm3, %v2443_v21 }
0x455e   :  { %v2504_v25 = vpop.f32.mrb[56].mxu1 }
0x455f   :  { %v2505_v26 = vadd.f32 %v2651_v23, %v2504_v25  ;;  %v2987_v27 = vpop.f32.mrb[57].mxu1 }
0x4560   :  { %v2507_v28 = vpop.f32.mrb[58].mxu1 }
0x4561   :  { %v2510_v1 = vmax.f32 %v2505_v26, 0.0  ;;  %v2988_v29 = vpop.f32.mrb[59].mxu1 }
0x4563   :  { %v2511_v31 = vpack.c.bf16 %v2510_v1, %v2510_v1 }
0x4565   :  { %2994 = vmatmul.mubr.msk.bf16.vlgmr.msra.gmra.mrb[60].mxu0 %vm178_vm3, %v2511_v31 }
0x4638   :  { %v2572_v33 = vpop.f32.mrb[60].mxu0 }
0x4639   :  { %v2573_v35 = vadd.f32 %v2655_v32, %v2572_v33  ;;  %v2995_v37 = vpop.f32.mrb[61].mxu0 }
0x463a   :  { %v2575_v19 = vpop.f32.mrb[62].mxu0 }
0x463b   :  { %v2578_v38 = vmax.f32 %v2573_v35, 0.0  ;;  %v2996_v51 = vpop.f32.mrb[63].mxu0 }
0x463d   :  { %2580 = vst.msk [vmem:[%s4018_s13] sm:$0xff] %vm2579_vm12, %v2578_v38 }
0x463e   :  { %2585 = vsyncpa [#allocation5], 1 }
0x463f   :  { %2586 = vsyncpa [#allocation7], 1 }
0x4640   :  { %2587 = vsyncpa [#allocation10], 1 }

</bundles_post_ra>
